<compile_context>
chip_gen: v7x
topology: tpu7x:2x2x1
jax: 0.10.0
libtpu: 0.0.40
codegen_flags: <defaults>
</compile_context>

<pallas_src>
import functools
import math

import jax
import jax.numpy as jnp
import numpy as np
from jax.experimental import pallas as pl

LN_EPS = 1e-6
NEG_INF = -1e30


# ----------------------------- shared helper -------------------------------
def _layer_norm(x, gamma, beta, eps=LN_EPS):
    mu = jnp.mean(x, axis=-1, keepdims=True)
    var = jnp.mean((x - mu) ** 2, axis=-1, keepdims=True)
    return (x - mu) * jax.lax.rsqrt(var + eps) * gamma + beta


# ------------------------------ fused kernel -------------------------------
def _encoder_kernel(n_layers, n_head, d_k, d_v, batch, seq_len,
                    src_ref, pos_ref, mask_ref,
                    w_emb_ref, b_emb_ref, g0_ref, be0_ref,
                    wqkvT_ref, wo_ref, g1_ref, be1_ref,
                    w1_ref, b1_ref, w2_ref, b2_ref, g2_ref, be2_ref,
                    out_ref):
    """Whole encoder (embedding + all layers) for the whole batch in one shot."""
    H, dk, dv = n_head, d_k, d_v
    BS = batch * seq_len
    hdk, hdv = H * dk, H * dv

    # ---- embedding Linear + positional encoding + LayerNorm ----------------
    # (dropout is identity in eval mode)
    x = jnp.dot(src_ref[...], w_emb_ref[...], preferred_element_type=jnp.float32)
    x = x + b_emb_ref[...] + pos_ref[...]
    x = _layer_norm(x, g0_ref[...], be0_ref[...])                  # (BS, D)

    mask = mask_ref[...]                                           # (BS, BS) additive

    for l in range(n_layers):                                      # static unroll
        # ---- multi-head self-attention -------------------------------------
        # ONE fused QKV matmul, feature-major output so q/k/v split along
        # sublanes (free) instead of lanes.  1/sqrt(dk) is folded into the
        # Q rows of the packed weight.
        qkvT = jnp.einsum('fd,nd->fn', wqkvT_ref[l], x,
                          preferred_element_type=jnp.float32)      # (2hdk+hdv, BS)

        qT = qkvT[:hdk].reshape(H, dk, BS)                         # (H, dk, BS)
        kT = qkvT[hdk:2 * hdk].reshape(H, dk, BS)                  # (H, dk, BS)
        vT = qkvT[2 * hdk:].reshape(H, dv, BS)                     # (H, dv, BS)

        q = jnp.swapaxes(qT, 1, 2)                                 # (H, BS, dk)

        # scores for every (query,key) pair of the flattened batch; the
        # additive mask removes cross-batch attention so softmax matches the
        # per-batch reference exactly.
        s = jnp.einsum('hqd,hdk->hqk', q, kT,
                       preferred_element_type=jnp.float32)         # (H, BS, BS)
        s = s + mask
        s = s - jnp.max(s, axis=-1, keepdims=True)
        e = jnp.exp(s)
        attn = e / jnp.sum(e, axis=-1, keepdims=True)              # exact softmax

        ctxT = jnp.einsum('hdk,hqk->hdq', vT, attn,
                          preferred_element_type=jnp.float32)      # (H, dv, BS)
        ctx = ctxT.reshape(hdv, BS).T                              # (BS, H*dv)

        # fused output projection + head reduction: one (BS,hdv)x(hdv,D) matmul
        a = jnp.dot(ctx, wo_ref[l], preferred_element_type=jnp.float32)

        o = _layer_norm(a + x, g1_ref[l], be1_ref[l])              # post-norm MHA

        # ---- position-wise feed-forward ------------------------------------
        h1 = jnp.dot(o, w1_ref[l], preferred_element_type=jnp.float32) + b1_ref[l]
        h1 = jnp.maximum(h1, 0.0)
        f = jnp.dot(h1, w2_ref[l], preferred_element_type=jnp.float32) + b2_ref[l]
        x = _layer_norm(f + o, g2_ref[l], be2_ref[l])              # post-norm FFN

    # NOTE: D=32 (< 128 lanes) forces masked partial stores; unavoidable
    # without padding d_model (review: only worth it if VALU/store bound).
    out_ref[...] = x


# ------------------------------ wrappers ------------------------------------
def _pack_params(params, cfg):
    """Re-layout torch-style weights into the kernel's fused / stacked form."""
    dk = cfg["d_k"]
    scale = 1.0 / math.sqrt(dk)

    wqkvT_l = []
    for lp in params["layers"]:
        wq_t = (lp["wq"] * scale).T           # (H*dk, D)  -- scale folded in
        wk_t = lp["wk"].T                     # (H*dk, D)
        wv_t = lp["wv"].T                     # (H*dv, D)
        wqkvT_l.append(jnp.concatenate([wq_t, wk_t, wv_t], axis=0))

    def stack(name):
        return jnp.stack([lp[name] for lp in params["layers"]])

    return dict(
        wqkvT=jnp.stack(wqkvT_l),             # (L, 2*H*dk + H*dv, D)
        wo=stack("wo"),                       # (L, H*dv, D)   flat, head-major rows
        ln1_g=stack("ln1_g"), ln1_b=stack("ln1_b"),
        w1=stack("w1"), b1=stack("b1"), w2=stack("w2"), b2=stack("b2"),
        ln2_g=stack("ln2_g"), ln2_b=stack("ln2_b"),
    )


def encoder_forward(src, params, cfg):
    B, S, Din = src.shape
    D, L = cfg["d_model"], cfg["n_layers"]
    kp = _pack_params(params, cfg)

    src2 = src.reshape(B * S, Din)                       # batch folded into rows
    pos2 = jnp.tile(params["pos"][:S], (B, 1))           # (B*S, D) pos table

    # additive attention mask: 0 within a batch element, -1e30 across elements
    bid = np.repeat(np.arange(B), S)
    mask = jnp.asarray(
        np.where(bid[:, None] == bid[None, :], 0.0, NEG_INF).astype(np.float32))

    kern = functools.partial(_encoder_kernel, L, cfg["n_head"], cfg["d_k"],
                             cfg["d_v"], B, S)
    out2 = pl.pallas_call(
        kern,
        out_shape=jax.ShapeDtypeStruct((B * S, D), jnp.float32),
        # Gridless / no BlockSpecs: every operand fits whole in VMEM
        # (< 100 KiB total), so a single un-tiled invocation avoids all
        # per-step pipeline overhead (see scaling TODO at the top).
    )(src2, pos2, mask,
      params["w_emb"], params["b_emb"], params["ln_g"], params["ln_b"],
      kp["wqkvT"], kp["wo"], kp["ln1_g"], kp["ln1_b"],
      kp["w1"], kp["b1"], kp["w2"], kp["b2"], kp["ln2_g"], kp["ln2_b"])
    return (out2.reshape(B, S, D),)


# ------------------------- parameter construction ---------------------------
def sinusoid_table(seq_len, d_hid):
    pos = np.arange(seq_len, dtype=np.float32)[:, None]
    j = np.arange(d_hid)
    angle = pos / np.power(10000.0, 2.0 * (j // 2) / d_hid)
    table = np.where(j % 2 == 0, np.sin(angle), np.cos(angle)).astype(np.float32)
    return jnp.asarray(table)                                       # (seq_len, d_hid)


def init_params(key, cfg):
    Din, D = cfg["in_features_dim"], cfg["d_model"]
    H, dk, dv, Dff = cfg["n_head"], cfg["d_k"], cfg["d_v"], cfg["d_inner"]

    def nrm(k, shape):
        return 0.05 * jax.random.normal(k, shape, dtype=jnp.float32)

    keys = jax.random.split(key, 3 + 8 * cfg["n_layers"])
    params = {
        "w_emb": nrm(keys[0], (Din, D)),
        "b_emb": nrm(keys[1], (1, D)),
        "pos": sinusoid_table(cfg["sequence_length"], D),
        "ln_g": jnp.ones((1, D), jnp.float32),
        "ln_b": jnp.zeros((1, D), jnp.float32),
        "layers": [],
    }
    ki = 2
    for _ in range(cfg["n_layers"]):
        lp = {
            "wq": nrm(keys[ki + 0], (D, H * dk)),
            "wk": nrm(keys[ki + 1], (D, H * dk)),
            "wv": nrm(keys[ki + 2], (D, H * dv)),
            "wo": nrm(keys[ki + 3], (H * dv, D)),
            "ln1_g": jnp.ones((1, D), jnp.float32),
            "ln1_b": jnp.zeros((1, D), jnp.float32),
            "w1": nrm(keys[ki + 4], (D, Dff)),
            "b1": nrm(keys[ki + 5], (1, Dff)),
            "w2": nrm(keys[ki + 6], (Dff, D)),
            "b2": nrm(keys[ki + 7], (1, D)),
            "ln2_g": jnp.ones((1, D), jnp.float32),
            "ln2_b": jnp.zeros((1, D), jnp.float32),
        }
        params["layers"].append(lp)
        ki += 8
    return params


# ----------------------- pure-JAX reference (check) --------------------------
def reference_forward(src, p, cfg):
    H, dk, dv = cfg["n_head"], cfg["d_k"], cfg["d_v"]
    x = src @ p["w_emb"] + p["b_emb"]
    x = x + p["pos"][: x.shape[1]][None]
    x = _layer_norm(x, p["ln_g"], p["ln_b"])
    for lp in p["layers"]:
        B, S, D = x.shape
        q = (x @ lp["wq"]).reshape(B, S, H, dk).transpose(0, 2, 1, 3)
        k = (x @ lp["wk"]).reshape(B, S, H, dk).transpose(0, 2, 1, 3)
        v = (x @ lp["wv"]).reshape(B, S, H, dv).transpose(0, 2, 1, 3)
        scores = jnp.einsum("bhqd,bhkd->bhqk", q, k) / math.sqrt(dk)
        attn = jax.nn.softmax(scores, axis=-1)
        ctx = jnp.einsum("bhqk,bhkd->bhqd", attn, v).transpose(0, 2, 1, 3).reshape(B, S, H * dv)
        o = _layer_norm(ctx @ lp["wo"] + x, lp["ln1_g"], lp["ln1_b"])
        f = jnp.maximum(o @ lp["w1"] + lp["b1"], 0.0) @ lp["w2"] + lp["b2"] + o
        x = _layer_norm(f, lp["ln2_g"], lp["ln2_b"])
    return x


# --------------------------------- main --------------------------------------
if __name__ == "__main__":
    cfg = dict(
        in_features_dim=16,
        d_model=32,            # out_features_dim == d_model
        n_layers=2,
        n_head=4,
        d_k=8,
        d_v=8,
        d_inner=64,
        sequence_length=270,
        seq_len=8,             # actual input sequence length (<= sequence_length)
        batch=2,
    )
    key = jax.random.PRNGKey(0)
    k_x, k_p = jax.random.split(key)
    src = jax.random.normal(k_x, (cfg["batch"], cfg["seq_len"], cfg["in_features_dim"]),
                            dtype=jnp.float32)
    params = init_params(k_p, cfg)

    (out,) = encoder_forward(src, params, cfg)
    out = jax.block_until_ready(out)

    ref = jax.block_until_ready(reference_forward(src, params, cfg))
    # Exact softmax divide is used in-kernel, so parity with the reference is
    # back to ~1e-4 (review correctness concern addressed).
    np.testing.assert_allclose(np.asarray(out), np.asarray(ref), rtol=2e-4, atol=2e-4)

    print("KERNEL_OK")
</pallas_src>

<mosaic_0001>
module attributes {stable_mosaic.version = 11 : i64} {
  func.func @_encoder_kernel(%arg0: memref<16x16xf32, #tpu.memory_space<vmem>>, %arg1: memref<16x32xf32, #tpu.memory_space<vmem>>, %arg2: memref<16x16xf32, #tpu.memory_space<vmem>>, %arg3: memref<16x32xf32, #tpu.memory_space<vmem>>, %arg4: memref<1x32xf32, #tpu.memory_space<vmem>>, %arg5: memref<1x32xf32, #tpu.memory_space<vmem>>, %arg6: memref<1x32xf32, #tpu.memory_space<vmem>>, %arg7: memref<2x96x32xf32, #tpu.memory_space<vmem>>, %arg8: memref<2x32x32xf32, #tpu.memory_space<vmem>>, %arg9: memref<2x1x32xf32, #tpu.memory_space<vmem>>, %arg10: memref<2x1x32xf32, #tpu.memory_space<vmem>>, %arg11: memref<2x32x64xf32, #tpu.memory_space<vmem>>, %arg12: memref<2x1x64xf32, #tpu.memory_space<vmem>>, %arg13: memref<2x64x32xf32, #tpu.memory_space<vmem>>, %arg14: memref<2x1x32xf32, #tpu.memory_space<vmem>>, %arg15: memref<2x1x32xf32, #tpu.memory_space<vmem>>, %arg16: memref<2x1x32xf32, #tpu.memory_space<vmem>>, %arg17: memref<16x32xf32, #tpu.memory_space<vmem>>) attributes {dimension_semantics = [], scalar_prefetch = 0 : i64, scratch_operands = 0 : i64, tpu.core_type = #tpu.core_type<tc>} {
    %c0 = arith.constant 0 : index
    %c0_0 = arith.constant 0 : index
    %0 = vector.load %arg0[%c0, %c0_0] : memref<16x16xf32, #tpu.memory_space<vmem>>, vector<16x16xf32>
    %c0_1 = arith.constant 0 : index
    %c0_2 = arith.constant 0 : index
    %1 = vector.load %arg3[%c0_1, %c0_2] : memref<16x32xf32, #tpu.memory_space<vmem>>, vector<16x32xf32>
    %cst = arith.constant dense<0.000000e+00> : vector<16x32xf32>
    %2 = tpu.matmul %0, %1, %cst {dimension_numbers = #tpu.dot_dimension_numbers<[1], [0], [0], [1], [0, 0, 1, 1], [], []>} : vector<16x16xf32>, vector<16x32xf32>, vector<16x32xf32> -> vector<16x32xf32>
    %c0_3 = arith.constant 0 : index
    %c0_4 = arith.constant 0 : index
    %3 = vector.load %arg4[%c0_3, %c0_4] : memref<1x32xf32, #tpu.memory_space<vmem>>, vector<1x32xf32>
    %4 = vector.broadcast %3 : vector<1x32xf32> to vector<16x32xf32>
    %5 = arith.addf %2, %4 : vector<16x32xf32>
    %c0_5 = arith.constant 0 : index
    %c0_6 = arith.constant 0 : index
    %6 = vector.load %arg1[%c0_5, %c0_6] : memref<16x32xf32, #tpu.memory_space<vmem>>, vector<16x32xf32>
    %7 = arith.addf %5, %6 : vector<16x32xf32>
    %c0_7 = arith.constant 0 : index
    %c0_8 = arith.constant 0 : index
    %8 = vector.load %arg5[%c0_7, %c0_8] : memref<1x32xf32, #tpu.memory_space<vmem>>, vector<1x32xf32>
    %c0_9 = arith.constant 0 : index
    %c0_10 = arith.constant 0 : index
    %9 = vector.load %arg6[%c0_9, %c0_10] : memref<1x32xf32, #tpu.memory_space<vmem>>, vector<1x32xf32>
    %cst_11 = arith.constant dense<0.000000e+00> : vector<16xf32>
    %10 = vector.multi_reduction <add>, %7, %cst_11 [1] : vector<16x32xf32> to vector<16xf32>
    %11 = vector.shape_cast %10 : vector<16xf32> to vector<16x1xf32>
    %cst_12 = arith.constant 3.200000e+01 : f32
    %12 = vector.broadcast %cst_12 : f32 to vector<16x1xf32>
    %13 = arith.divf %11, %12 : vector<16x1xf32>
    %14 = vector.broadcast %13 : vector<16x1xf32> to vector<16x32xf32>
    %15 = arith.subf %7, %14 : vector<16x32xf32>
    %16 = arith.mulf %15, %15 : vector<16x32xf32>
    %cst_13 = arith.constant dense<0.000000e+00> : vector<16xf32>
    %17 = vector.multi_reduction <add>, %16, %cst_13 [1] : vector<16x32xf32> to vector<16xf32>
    %18 = vector.shape_cast %17 : vector<16xf32> to vector<16x1xf32>
    %cst_14 = arith.constant 3.200000e+01 : f32
    %19 = vector.broadcast %cst_14 : f32 to vector<16x1xf32>
    %20 = arith.divf %18, %19 : vector<16x1xf32>
    %21 = vector.broadcast %13 : vector<16x1xf32> to vector<16x32xf32>
    %22 = arith.subf %7, %21 : vector<16x32xf32>
    %cst_15 = arith.constant 9.99999997E-7 : f32
    %23 = vector.broadcast %cst_15 : f32 to vector<16x1xf32>
    %24 = arith.addf %20, %23 : vector<16x1xf32>
    %25 = math.rsqrt %24 : vector<16x1xf32>
    %26 = vector.broadcast %25 : vector<16x1xf32> to vector<16x32xf32>
    %27 = arith.mulf %22, %26 : vector<16x32xf32>
    %28 = vector.broadcast %8 : vector<1x32xf32> to vector<16x32xf32>
    %29 = arith.mulf %27, %28 : vector<16x32xf32>
    %30 = vector.broadcast %9 : vector<1x32xf32> to vector<16x32xf32>
    %31 = arith.addf %29, %30 : vector<16x32xf32>
    %c0_16 = arith.constant 0 : index
    %c0_17 = arith.constant 0 : index
    %32 = vector.load %arg2[%c0_16, %c0_17] : memref<16x16xf32, #tpu.memory_space<vmem>>, vector<16x16xf32>
    %c0_18 = arith.constant 0 : index
    %c0_19 = arith.constant 0 : index
    %c0_20 = arith.constant 0 : index
    %33 = vector.load %arg7[%c0_18, %c0_19, %c0_20] : memref<2x96x32xf32, #tpu.memory_space<vmem>>, vector<1x96x32xf32>
    %34 = vector.shape_cast %33 : vector<1x96x32xf32> to vector<96x32xf32>
    "tpu.trace_start"() <{level = 10 : i32, message = "fd,nd->fn"}> : () -> ()
    %cst_21 = arith.constant dense<0.000000e+00> : vector<96x16xf32>
    %35 = tpu.matmul %34, %31, %cst_21 {dimension_numbers = #tpu.dot_dimension_numbers<[1], [1], [0], [0], [0, 0, 1, 0], [], []>} : vector<96x32xf32>, vector<16x32xf32>, vector<96x16xf32> -> vector<96x16xf32>
    "tpu.trace_stop"() : () -> ()
    %36 = vector.extract_strided_slice %35 {offsets = [0, 0], sizes = [32, 16], strides = [1, 1]} : vector<96x16xf32> to vector<32x16xf32>
    %37 = vector.shape_cast %36 : vector<32x16xf32> to vector<4x8x16xf32>
    %38 = vector.extract_strided_slice %35 {offsets = [32, 0], sizes = [32, 16], strides = [1, 1]} : vector<96x16xf32> to vector<32x16xf32>
    %39 = vector.shape_cast %38 : vector<32x16xf32> to vector<4x8x16xf32>
    %40 = vector.extract_strided_slice %35 {offsets = [64, 0], sizes = [32, 16], strides = [1, 1]} : vector<96x16xf32> to vector<32x16xf32>
    %41 = vector.shape_cast %40 : vector<32x16xf32> to vector<4x8x16xf32>
    %42 = tpu.transpose %37, [0, 2, 1] : vector<4x8x16xf32> -> vector<4x16x8xf32>
    "tpu.trace_start"() <{level = 10 : i32, message = "hqd,hdk->hqk"}> : () -> ()
    %cst_22 = arith.constant dense<0.000000e+00> : vector<4x16x16xf32>
    %43 = tpu.matmul %42, %39, %cst_22 {dimension_numbers = #tpu.dot_dimension_numbers<[2], [1], [1], [2], [0, 0, 0, 1, 1, 2], [0], [0]>} : vector<4x16x8xf32>, vector<4x8x16xf32>, vector<4x16x16xf32> -> vector<4x16x16xf32>
    "tpu.trace_stop"() : () -> ()
    %44 = vector.shape_cast %32 : vector<16x16xf32> to vector<1x16x16xf32>
    %45 = vector.broadcast %44 : vector<1x16x16xf32> to vector<4x16x16xf32>
    %46 = arith.addf %43, %45 : vector<4x16x16xf32>
    %cst_23 = arith.constant dense<0xFF800000> : vector<4x16xf32>
    %47 = vector.multi_reduction <maximumf>, %46, %cst_23 [2] : vector<4x16x16xf32> to vector<4x16xf32>
    %48 = vector.shape_cast %47 : vector<4x16xf32> to vector<4x16x1xf32>
    %49 = vector.broadcast %48 : vector<4x16x1xf32> to vector<4x16x16xf32>
    %50 = arith.subf %46, %49 : vector<4x16x16xf32>
    %51 = math.exp %50 : vector<4x16x16xf32>
    %cst_24 = arith.constant dense<0.000000e+00> : vector<4x16xf32>
    %52 = vector.multi_reduction <add>, %51, %cst_24 [2] : vector<4x16x16xf32> to vector<4x16xf32>
    %53 = vector.shape_cast %52 : vector<4x16xf32> to vector<4x16x1xf32>
    %54 = vector.broadcast %53 : vector<4x16x1xf32> to vector<4x16x16xf32>
    %55 = arith.divf %51, %54 : vector<4x16x16xf32>
    "tpu.trace_start"() <{level = 10 : i32, message = "hdk,hqk->hdq"}> : () -> ()
    %cst_25 = arith.constant dense<0.000000e+00> : vector<4x8x16xf32>
    %56 = tpu.matmul %41, %55, %cst_25 {dimension_numbers = #tpu.dot_dimension_numbers<[2], [2], [1], [1], [0, 0, 0, 1, 1, 1], [0], [0]>} : vector<4x8x16xf32>, vector<4x16x16xf32>, vector<4x8x16xf32> -> vector<4x8x16xf32>
    "tpu.trace_stop"() : () -> ()
    %57 = vector.shape_cast %56 : vector<4x8x16xf32> to vector<32x16xf32>
    %58 = tpu.transpose %57, [1, 0] : vector<32x16xf32> -> vector<16x32xf32>
    %c0_26 = arith.constant 0 : index
    %c0_27 = arith.constant 0 : index
    %c0_28 = arith.constant 0 : index
    %59 = vector.load %arg8[%c0_26, %c0_27, %c0_28] : memref<2x32x32xf32, #tpu.memory_space<vmem>>, vector<1x32x32xf32>
    %60 = vector.shape_cast %59 : vector<1x32x32xf32> to vector<32x32xf32>
    %cst_29 = arith.constant dense<0.000000e+00> : vector<16x32xf32>
    %61 = tpu.matmul %58, %60, %cst_29 {dimension_numbers = #tpu.dot_dimension_numbers<[1], [0], [0], [1], [0, 0, 1, 1], [], []>} : vector<16x32xf32>, vector<32x32xf32>, vector<16x32xf32> -> vector<16x32xf32>
    %62 = arith.addf %61, %31 : vector<16x32xf32>
    %c0_30 = arith.constant 0 : index
    %c0_31 = arith.constant 0 : index
    %c0_32 = arith.constant 0 : index
    %63 = vector.load %arg9[%c0_30, %c0_31, %c0_32] : memref<2x1x32xf32, #tpu.memory_space<vmem>>, vector<1x1x32xf32>
    %64 = vector.shape_cast %63 : vector<1x1x32xf32> to vector<1x32xf32>
    %c0_33 = arith.constant 0 : index
    %c0_34 = arith.constant 0 : index
    %c0_35 = arith.constant 0 : index
    %65 = vector.load %arg10[%c0_33, %c0_34, %c0_35] : memref<2x1x32xf32, #tpu.memory_space<vmem>>, vector<1x1x32xf32>
    %66 = vector.shape_cast %65 : vector<1x1x32xf32> to vector<1x32xf32>
    %cst_36 = arith.constant dense<0.000000e+00> : vector<16xf32>
    %67 = vector.multi_reduction <add>, %62, %cst_36 [1] : vector<16x32xf32> to vector<16xf32>
    %68 = vector.shape_cast %67 : vector<16xf32> to vector<16x1xf32>
    %cst_37 = arith.constant 3.200000e+01 : f32
    %69 = vector.broadcast %cst_37 : f32 to vector<16x1xf32>
    %70 = arith.divf %68, %69 : vector<16x1xf32>
    %71 = vector.broadcast %70 : vector<16x1xf32> to vector<16x32xf32>
    %72 = arith.subf %62, %71 : vector<16x32xf32>
    %73 = arith.mulf %72, %72 : vector<16x32xf32>
    %cst_38 = arith.constant dense<0.000000e+00> : vector<16xf32>
    %74 = vector.multi_reduction <add>, %73, %cst_38 [1] : vector<16x32xf32> to vector<16xf32>
    %75 = vector.shape_cast %74 : vector<16xf32> to vector<16x1xf32>
    %cst_39 = arith.constant 3.200000e+01 : f32
    %76 = vector.broadcast %cst_39 : f32 to vector<16x1xf32>
    %77 = arith.divf %75, %76 : vector<16x1xf32>
    %78 = vector.broadcast %70 : vector<16x1xf32> to vector<16x32xf32>
    %79 = arith.subf %62, %78 : vector<16x32xf32>
    %cst_40 = arith.constant 9.99999997E-7 : f32
    %80 = vector.broadcast %cst_40 : f32 to vector<16x1xf32>
    %81 = arith.addf %77, %80 : vector<16x1xf32>
    %82 = math.rsqrt %81 : vector<16x1xf32>
    %83 = vector.broadcast %82 : vector<16x1xf32> to vector<16x32xf32>
    %84 = arith.mulf %79, %83 : vector<16x32xf32>
    %85 = vector.broadcast %64 : vector<1x32xf32> to vector<16x32xf32>
    %86 = arith.mulf %84, %85 : vector<16x32xf32>
    %87 = vector.broadcast %66 : vector<1x32xf32> to vector<16x32xf32>
    %88 = arith.addf %86, %87 : vector<16x32xf32>
    %c0_41 = arith.constant 0 : index
    %c0_42 = arith.constant 0 : index
    %c0_43 = arith.constant 0 : index
    %89 = vector.load %arg11[%c0_41, %c0_42, %c0_43] : memref<2x32x64xf32, #tpu.memory_space<vmem>>, vector<1x32x64xf32>
    %90 = vector.shape_cast %89 : vector<1x32x64xf32> to vector<32x64xf32>
    %cst_44 = arith.constant dense<0.000000e+00> : vector<16x64xf32>
    %91 = tpu.matmul %88, %90, %cst_44 {dimension_numbers = #tpu.dot_dimension_numbers<[1], [0], [0], [1], [0, 0, 1, 1], [], []>} : vector<16x32xf32>, vector<32x64xf32>, vector<16x64xf32> -> vector<16x64xf32>
    %c0_45 = arith.constant 0 : index
    %c0_46 = arith.constant 0 : index
    %c0_47 = arith.constant 0 : index
    %92 = vector.load %arg12[%c0_45, %c0_46, %c0_47] : memref<2x1x64xf32, #tpu.memory_space<vmem>>, vector<1x1x64xf32>
    %93 = vector.shape_cast %92 : vector<1x1x64xf32> to vector<1x64xf32>
    %94 = vector.broadcast %93 : vector<1x64xf32> to vector<16x64xf32>
    %95 = arith.addf %91, %94 : vector<16x64xf32>
    %cst_48 = arith.constant 0.000000e+00 : f32
    %96 = vector.broadcast %cst_48 : f32 to vector<16x64xf32>
    %97 = arith.maximumf %95, %96 : vector<16x64xf32>
    %c0_49 = arith.constant 0 : index
    %c0_50 = arith.constant 0 : index
    %c0_51 = arith.constant 0 : index
    %98 = vector.load %arg13[%c0_49, %c0_50, %c0_51] : memref<2x64x32xf32, #tpu.memory_space<vmem>>, vector<1x64x32xf32>
    %99 = vector.shape_cast %98 : vector<1x64x32xf32> to vector<64x32xf32>
    %cst_52 = arith.constant dense<0.000000e+00> : vector<16x32xf32>
    %100 = tpu.matmul %97, %99, %cst_52 {dimension_numbers = #tpu.dot_dimension_numbers<[1], [0], [0], [1], [0, 0, 1, 1], [], []>} : vector<16x64xf32>, vector<64x32xf32>, vector<16x32xf32> -> vector<16x32xf32>
    %c0_53 = arith.constant 0 : index
    %c0_54 = arith.constant 0 : index
    %c0_55 = arith.constant 0 : index
    %101 = vector.load %arg14[%c0_53, %c0_54, %c0_55] : memref<2x1x32xf32, #tpu.memory_space<vmem>>, vector<1x1x32xf32>
    %102 = vector.shape_cast %101 : vector<1x1x32xf32> to vector<1x32xf32>
    %103 = vector.broadcast %102 : vector<1x32xf32> to vector<16x32xf32>
    %104 = arith.addf %100, %103 : vector<16x32xf32>
    %105 = arith.addf %104, %88 : vector<16x32xf32>
    %c0_56 = arith.constant 0 : index
    %c0_57 = arith.constant 0 : index
    %c0_58 = arith.constant 0 : index
    %106 = vector.load %arg15[%c0_56, %c0_57, %c0_58] : memref<2x1x32xf32, #tpu.memory_space<vmem>>, vector<1x1x32xf32>
    %107 = vector.shape_cast %106 : vector<1x1x32xf32> to vector<1x32xf32>
    %c0_59 = arith.constant 0 : index
    %c0_60 = arith.constant 0 : index
    %c0_61 = arith.constant 0 : index
    %108 = vector.load %arg16[%c0_59, %c0_60, %c0_61] : memref<2x1x32xf32, #tpu.memory_space<vmem>>, vector<1x1x32xf32>
    %109 = vector.shape_cast %108 : vector<1x1x32xf32> to vector<1x32xf32>
    %cst_62 = arith.constant dense<0.000000e+00> : vector<16xf32>
    %110 = vector.multi_reduction <add>, %105, %cst_62 [1] : vector<16x32xf32> to vector<16xf32>
    %111 = vector.shape_cast %110 : vector<16xf32> to vector<16x1xf32>
    %cst_63 = arith.constant 3.200000e+01 : f32
    %112 = vector.broadcast %cst_63 : f32 to vector<16x1xf32>
    %113 = arith.divf %111, %112 : vector<16x1xf32>
    %114 = vector.broadcast %113 : vector<16x1xf32> to vector<16x32xf32>
    %115 = arith.subf %105, %114 : vector<16x32xf32>
    %116 = arith.mulf %115, %115 : vector<16x32xf32>
    %cst_64 = arith.constant dense<0.000000e+00> : vector<16xf32>
    %117 = vector.multi_reduction <add>, %116, %cst_64 [1] : vector<16x32xf32> to vector<16xf32>
    %118 = vector.shape_cast %117 : vector<16xf32> to vector<16x1xf32>
    %cst_65 = arith.constant 3.200000e+01 : f32
    %119 = vector.broadcast %cst_65 : f32 to vector<16x1xf32>
    %120 = arith.divf %118, %119 : vector<16x1xf32>
    %121 = vector.broadcast %113 : vector<16x1xf32> to vector<16x32xf32>
    %122 = arith.subf %105, %121 : vector<16x32xf32>
    %cst_66 = arith.constant 9.99999997E-7 : f32
    %123 = vector.broadcast %cst_66 : f32 to vector<16x1xf32>
    %124 = arith.addf %120, %123 : vector<16x1xf32>
    %125 = math.rsqrt %124 : vector<16x1xf32>
    %126 = vector.broadcast %125 : vector<16x1xf32> to vector<16x32xf32>
    %127 = arith.mulf %122, %126 : vector<16x32xf32>
    %128 = vector.broadcast %107 : vector<1x32xf32> to vector<16x32xf32>
    %129 = arith.mulf %127, %128 : vector<16x32xf32>
    %130 = vector.broadcast %109 : vector<1x32xf32> to vector<16x32xf32>
    %131 = arith.addf %129, %130 : vector<16x32xf32>
    %c1 = arith.constant 1 : index
    %c0_67 = arith.constant 0 : index
    %c0_68 = arith.constant 0 : index
    %132 = vector.load %arg7[%c1, %c0_67, %c0_68] : memref<2x96x32xf32, #tpu.memory_space<vmem>>, vector<1x96x32xf32>
    %133 = vector.shape_cast %132 : vector<1x96x32xf32> to vector<96x32xf32>
    "tpu.trace_start"() <{level = 10 : i32, message = "fd,nd->fn"}> : () -> ()
    %cst_69 = arith.constant dense<0.000000e+00> : vector<96x16xf32>
    %134 = tpu.matmul %133, %131, %cst_69 {dimension_numbers = #tpu.dot_dimension_numbers<[1], [1], [0], [0], [0, 0, 1, 0], [], []>} : vector<96x32xf32>, vector<16x32xf32>, vector<96x16xf32> -> vector<96x16xf32>
    "tpu.trace_stop"() : () -> ()
    %135 = vector.extract_strided_slice %134 {offsets = [0, 0], sizes = [32, 16], strides = [1, 1]} : vector<96x16xf32> to vector<32x16xf32>
    %136 = vector.shape_cast %135 : vector<32x16xf32> to vector<4x8x16xf32>
    %137 = vector.extract_strided_slice %134 {offsets = [32, 0], sizes = [32, 16], strides = [1, 1]} : vector<96x16xf32> to vector<32x16xf32>
    %138 = vector.shape_cast %137 : vector<32x16xf32> to vector<4x8x16xf32>
    %139 = vector.extract_strided_slice %134 {offsets = [64, 0], sizes = [32, 16], strides = [1, 1]} : vector<96x16xf32> to vector<32x16xf32>
    %140 = vector.shape_cast %139 : vector<32x16xf32> to vector<4x8x16xf32>
    %141 = tpu.transpose %136, [0, 2, 1] : vector<4x8x16xf32> -> vector<4x16x8xf32>
    "tpu.trace_start"() <{level = 10 : i32, message = "hqd,hdk->hqk"}> : () -> ()
    %cst_70 = arith.constant dense<0.000000e+00> : vector<4x16x16xf32>
    %142 = tpu.matmul %141, %138, %cst_70 {dimension_numbers = #tpu.dot_dimension_numbers<[2], [1], [1], [2], [0, 0, 0, 1, 1, 2], [0], [0]>} : vector<4x16x8xf32>, vector<4x8x16xf32>, vector<4x16x16xf32> -> vector<4x16x16xf32>
    "tpu.trace_stop"() : () -> ()
    %143 = vector.shape_cast %32 : vector<16x16xf32> to vector<1x16x16xf32>
    %144 = vector.broadcast %143 : vector<1x16x16xf32> to vector<4x16x16xf32>
    %145 = arith.addf %142, %144 : vector<4x16x16xf32>
    %cst_71 = arith.constant dense<0xFF800000> : vector<4x16xf32>
    %146 = vector.multi_reduction <maximumf>, %145, %cst_71 [2] : vector<4x16x16xf32> to vector<4x16xf32>
    %147 = vector.shape_cast %146 : vector<4x16xf32> to vector<4x16x1xf32>
    %148 = vector.broadcast %147 : vector<4x16x1xf32> to vector<4x16x16xf32>
    %149 = arith.subf %145, %148 : vector<4x16x16xf32>
    %150 = math.exp %149 : vector<4x16x16xf32>
    %cst_72 = arith.constant dense<0.000000e+00> : vector<4x16xf32>
    %151 = vector.multi_reduction <add>, %150, %cst_72 [2] : vector<4x16x16xf32> to vector<4x16xf32>
    %152 = vector.shape_cast %151 : vector<4x16xf32> to vector<4x16x1xf32>
    %153 = vector.broadcast %152 : vector<4x16x1xf32> to vector<4x16x16xf32>
    %154 = arith.divf %150, %153 : vector<4x16x16xf32>
    "tpu.trace_start"() <{level = 10 : i32, message = "hdk,hqk->hdq"}> : () -> ()
    %cst_73 = arith.constant dense<0.000000e+00> : vector<4x8x16xf32>
    %155 = tpu.matmul %140, %154, %cst_73 {dimension_numbers = #tpu.dot_dimension_numbers<[2], [2], [1], [1], [0, 0, 0, 1, 1, 1], [0], [0]>} : vector<4x8x16xf32>, vector<4x16x16xf32>, vector<4x8x16xf32> -> vector<4x8x16xf32>
    "tpu.trace_stop"() : () -> ()
    %156 = vector.shape_cast %155 : vector<4x8x16xf32> to vector<32x16xf32>
    %157 = tpu.transpose %156, [1, 0] : vector<32x16xf32> -> vector<16x32xf32>
    %c1_74 = arith.constant 1 : index
    %c0_75 = arith.constant 0 : index
    %c0_76 = arith.constant 0 : index
    %158 = vector.load %arg8[%c1_74, %c0_75, %c0_76] : memref<2x32x32xf32, #tpu.memory_space<vmem>>, vector<1x32x32xf32>
    %159 = vector.shape_cast %158 : vector<1x32x32xf32> to vector<32x32xf32>
    %cst_77 = arith.constant dense<0.000000e+00> : vector<16x32xf32>
    %160 = tpu.matmul %157, %159, %cst_77 {dimension_numbers = #tpu.dot_dimension_numbers<[1], [0], [0], [1], [0, 0, 1, 1], [], []>} : vector<16x32xf32>, vector<32x32xf32>, vector<16x32xf32> -> vector<16x32xf32>
    %161 = arith.addf %160, %131 : vector<16x32xf32>
    %c1_78 = arith.constant 1 : index
    %c0_79 = arith.constant 0 : index
    %c0_80 = arith.constant 0 : index
    %162 = vector.load %arg9[%c1_78, %c0_79, %c0_80] : memref<2x1x32xf32, #tpu.memory_space<vmem>>, vector<1x1x32xf32>
    %163 = vector.shape_cast %162 : vector<1x1x32xf32> to vector<1x32xf32>
    %c1_81 = arith.constant 1 : index
    %c0_82 = arith.constant 0 : index
    %c0_83 = arith.constant 0 : index
    %164 = vector.load %arg10[%c1_81, %c0_82, %c0_83] : memref<2x1x32xf32, #tpu.memory_space<vmem>>, vector<1x1x32xf32>
    %165 = vector.shape_cast %164 : vector<1x1x32xf32> to vector<1x32xf32>
    %cst_84 = arith.constant dense<0.000000e+00> : vector<16xf32>
    %166 = vector.multi_reduction <add>, %161, %cst_84 [1] : vector<16x32xf32> to vector<16xf32>
    %167 = vector.shape_cast %166 : vector<16xf32> to vector<16x1xf32>
    %cst_85 = arith.constant 3.200000e+01 : f32
    %168 = vector.broadcast %cst_85 : f32 to vector<16x1xf32>
    %169 = arith.divf %167, %168 : vector<16x1xf32>
    %170 = vector.broadcast %169 : vector<16x1xf32> to vector<16x32xf32>
    %171 = arith.subf %161, %170 : vector<16x32xf32>
    %172 = arith.mulf %171, %171 : vector<16x32xf32>
    %cst_86 = arith.constant dense<0.000000e+00> : vector<16xf32>
    %173 = vector.multi_reduction <add>, %172, %cst_86 [1] : vector<16x32xf32> to vector<16xf32>
    %174 = vector.shape_cast %173 : vector<16xf32> to vector<16x1xf32>
    %cst_87 = arith.constant 3.200000e+01 : f32
    %175 = vector.broadcast %cst_87 : f32 to vector<16x1xf32>
    %176 = arith.divf %174, %175 : vector<16x1xf32>
    %177 = vector.broadcast %169 : vector<16x1xf32> to vector<16x32xf32>
    %178 = arith.subf %161, %177 : vector<16x32xf32>
    %cst_88 = arith.constant 9.99999997E-7 : f32
    %179 = vector.broadcast %cst_88 : f32 to vector<16x1xf32>
    %180 = arith.addf %176, %179 : vector<16x1xf32>
    %181 = math.rsqrt %180 : vector<16x1xf32>
    %182 = vector.broadcast %181 : vector<16x1xf32> to vector<16x32xf32>
    %183 = arith.mulf %178, %182 : vector<16x32xf32>
    %184 = vector.broadcast %163 : vector<1x32xf32> to vector<16x32xf32>
    %185 = arith.mulf %183, %184 : vector<16x32xf32>
    %186 = vector.broadcast %165 : vector<1x32xf32> to vector<16x32xf32>
    %187 = arith.addf %185, %186 : vector<16x32xf32>
    %c1_89 = arith.constant 1 : index
    %c0_90 = arith.constant 0 : index
    %c0_91 = arith.constant 0 : index
    %188 = vector.load %arg11[%c1_89, %c0_90, %c0_91] : memref<2x32x64xf32, #tpu.memory_space<vmem>>, vector<1x32x64xf32>
    %189 = vector.shape_cast %188 : vector<1x32x64xf32> to vector<32x64xf32>
    %cst_92 = arith.constant dense<0.000000e+00> : vector<16x64xf32>
    %190 = tpu.matmul %187, %189, %cst_92 {dimension_numbers = #tpu.dot_dimension_numbers<[1], [0], [0], [1], [0, 0, 1, 1], [], []>} : vector<16x32xf32>, vector<32x64xf32>, vector<16x64xf32> -> vector<16x64xf32>
    %c1_93 = arith.constant 1 : index
    %c0_94 = arith.constant 0 : index
    %c0_95 = arith.constant 0 : index
    %191 = vector.load %arg12[%c1_93, %c0_94, %c0_95] : memref<2x1x64xf32, #tpu.memory_space<vmem>>, vector<1x1x64xf32>
    %192 = vector.shape_cast %191 : vector<1x1x64xf32> to vector<1x64xf32>
    %193 = vector.broadcast %192 : vector<1x64xf32> to vector<16x64xf32>
    %194 = arith.addf %190, %193 : vector<16x64xf32>
    %cst_96 = arith.constant 0.000000e+00 : f32
    %195 = vector.broadcast %cst_96 : f32 to vector<16x64xf32>
    %196 = arith.maximumf %194, %195 : vector<16x64xf32>
    %c1_97 = arith.constant 1 : index
    %c0_98 = arith.constant 0 : index
    %c0_99 = arith.constant 0 : index
    %197 = vector.load %arg13[%c1_97, %c0_98, %c0_99] : memref<2x64x32xf32, #tpu.memory_space<vmem>>, vector<1x64x32xf32>
    %198 = vector.shape_cast %197 : vector<1x64x32xf32> to vector<64x32xf32>
    %cst_100 = arith.constant dense<0.000000e+00> : vector<16x32xf32>
    %199 = tpu.matmul %196, %198, %cst_100 {dimension_numbers = #tpu.dot_dimension_numbers<[1], [0], [0], [1], [0, 0, 1, 1], [], []>} : vector<16x64xf32>, vector<64x32xf32>, vector<16x32xf32> -> vector<16x32xf32>
    %c1_101 = arith.constant 1 : index
    %c0_102 = arith.constant 0 : index
    %c0_103 = arith.constant 0 : index
    %200 = vector.load %arg14[%c1_101, %c0_102, %c0_103] : memref<2x1x32xf32, #tpu.memory_space<vmem>>, vector<1x1x32xf32>
    %201 = vector.shape_cast %200 : vector<1x1x32xf32> to vector<1x32xf32>
    %202 = vector.broadcast %201 : vector<1x32xf32> to vector<16x32xf32>
    %203 = arith.addf %199, %202 : vector<16x32xf32>
    %204 = arith.addf %203, %187 : vector<16x32xf32>
    %c1_104 = arith.constant 1 : index
    %c0_105 = arith.constant 0 : index
    %c0_106 = arith.constant 0 : index
    %205 = vector.load %arg15[%c1_104, %c0_105, %c0_106] : memref<2x1x32xf32, #tpu.memory_space<vmem>>, vector<1x1x32xf32>
    %206 = vector.shape_cast %205 : vector<1x1x32xf32> to vector<1x32xf32>
    %c1_107 = arith.constant 1 : index
    %c0_108 = arith.constant 0 : index
    %c0_109 = arith.constant 0 : index
    %207 = vector.load %arg16[%c1_107, %c0_108, %c0_109] : memref<2x1x32xf32, #tpu.memory_space<vmem>>, vector<1x1x32xf32>
    %208 = vector.shape_cast %207 : vector<1x1x32xf32> to vector<1x32xf32>
    %cst_110 = arith.constant dense<0.000000e+00> : vector<16xf32>
    %209 = vector.multi_reduction <add>, %204, %cst_110 [1] : vector<16x32xf32> to vector<16xf32>
    %210 = vector.shape_cast %209 : vector<16xf32> to vector<16x1xf32>
    %cst_111 = arith.constant 3.200000e+01 : f32
    %211 = vector.broadcast %cst_111 : f32 to vector<16x1xf32>
    %212 = arith.divf %210, %211 : vector<16x1xf32>
    %213 = vector.broadcast %212 : vector<16x1xf32> to vector<16x32xf32>
    %214 = arith.subf %204, %213 : vector<16x32xf32>
    %215 = arith.mulf %214, %214 : vector<16x32xf32>
    %cst_112 = arith.constant dense<0.000000e+00> : vector<16xf32>
    %216 = vector.multi_reduction <add>, %215, %cst_112 [1] : vector<16x32xf32> to vector<16xf32>
    %217 = vector.shape_cast %216 : vector<16xf32> to vector<16x1xf32>
    %cst_113 = arith.constant 3.200000e+01 : f32
    %218 = vector.broadcast %cst_113 : f32 to vector<16x1xf32>
    %219 = arith.divf %217, %218 : vector<16x1xf32>
    %220 = vector.broadcast %212 : vector<16x1xf32> to vector<16x32xf32>
    %221 = arith.subf %204, %220 : vector<16x32xf32>
    %cst_114 = arith.constant 9.99999997E-7 : f32
    %222 = vector.broadcast %cst_114 : f32 to vector<16x1xf32>
    %223 = arith.addf %219, %222 : vector<16x1xf32>
    %224 = math.rsqrt %223 : vector<16x1xf32>
    %225 = vector.broadcast %224 : vector<16x1xf32> to vector<16x32xf32>
    %226 = arith.mulf %221, %225 : vector<16x32xf32>
    %227 = vector.broadcast %206 : vector<1x32xf32> to vector<16x32xf32>
    %228 = arith.mulf %226, %227 : vector<16x32xf32>
    %229 = vector.broadcast %208 : vector<1x32xf32> to vector<16x32xf32>
    %230 = arith.addf %228, %229 : vector<16x32xf32>
    %c0_115 = arith.constant 0 : index
    %c0_116 = arith.constant 0 : index
    %231 = vector.load %arg17[%c0_115, %c0_116] : memref<16x32xf32, #tpu.memory_space<vmem>>, vector<16x32xf32>
    tpu.vector_store %arg17[%c0_115, %c0_116], %230 {strides = array<i32>} : memref<16x32xf32, #tpu.memory_space<vmem>>, vector<16x32xf32>,
    return
  }
}

</mosaic_0001>

<bundles_post_ra>
// kernel: tpu_custom_call.1
= control target key start
LH: loop header
LB: loop body
LE: loop exit
PB: predicated region body
PF: predicated region fallthrough
CT: control target
= control target key end

     0   :  { %s4369_s0 = inlined_call_operand.vmem [shape: f32[16,16], index: 0, kind: input, shape index: {}]   ;;  %s4370_s1 = inlined_call_operand.vmem [shape: f32[16,32], index: 1, kind: input, shape index: {}]   ;;  %s4371_s2 = inlined_call_operand.vmem [shape: f32[16,16], index: 2, kind: input, shape index: {}]   ;;  %s4372_s3 = inlined_call_operand.vmem [shape: f32[16,32], index: 3, kind: input, shape index: {}]   ;;  %s4373_s4 = inlined_call_operand.vmem [shape: f32[1,32], index: 4, kind: input, shape index: {}]   ;;  %s4374_s5 = inlined_call_operand.vmem [shape: f32[1,32], index: 5, kind: input, shape index: {}]   ;;  %s4375_s6 = inlined_call_operand.vmem [shape: f32[1,32], index: 6, kind: input, shape index: {}]   ;;  %s4376_s7 = inlined_call_operand.vmem [shape: f32[2,96,32], index: 7, kind: input, shape index: {}]   ;;  %s4377_s8 = inlined_call_operand.vmem [shape: f32[2,32,32], index: 8, kind: input, shape index: {}]   ;;  %s4378_s9 = inlined_call_operand.vmem [shape: f32[2,1,32], index: 9, kind: input, shape index: {}]   ;;  %s4379_s10 = inlined_call_operand.vmem [shape: f32[2,1,32], index: 10, kind: input, shape index: {}]   ;;  %s4380_s11 = inlined_call_operand.vmem [shape: f32[2,32,64], index: 11, kind: input, shape index: {}]   ;;  %s4381_s12 = inlined_call_operand.vmem [shape: f32[2,1,64], index: 12, kind: input, shape index: {}]   ;;  %s4382_s13 = inlined_call_operand.vmem [shape: f32[2,64,32], index: 13, kind: input, shape index: {}]   ;;  %s4383_s14 = inlined_call_operand.vmem [shape: f32[2,1,32], index: 14, kind: input, shape index: {}]   ;;  %s4384_s15 = inlined_call_operand.vmem [shape: f32[2,1,32], index: 15, kind: input, shape index: {}]   ;;  %s4385_s16 = inlined_call_operand.vmem [shape: f32[2,1,32], index: 16, kind: input, shape index: {}]   ;;  %s4386_s17 = inlined_call_operand.hbm [shape: f32[16,32], index: 17, kind: output, shape index: {}]  }
   0x1   :  { %4389 = sst [smem:[#allocation5_spill]] %s4369_s0 }
   0x2   :  { %4390 = sst [smem:[#allocation6_spill]] %s4370_s1 }
   0x3   :  { %v59_v0 = vld [vmem:[%s4372_s3] sm:$0xff]  ;;  %v60_v1 = vld [vmem:[%s4372_s3 + $0x8] sm:$0xff]  ;;  %s4391_s0 = sld [smem:[#allocation5_spill]]  ;;  %vm68_vm0 = vcmask 130048  }
   0x4   :  { %v3580_v3 = vpack.c.bf16 %v60_v1, %v59_v0 }
   0x9   :  { %v57_v2 = vld [vmem:[%s4391_s0] sm:$0xff] }
   0xa   :  { %3355 = vmatprep.mubr.msk.f32.mxu0 %vm68_vm0, %v57_v2 }
   0xb   :  { %22 = vsyncpa [#allocation3], 0  ;;  %3581 = vmatprep.subr.bf16.mxu0 %v3580_v3  ;;  %v58_v4 = vld [vmem:[%s4391_s0 + $0x8] sm:$0xff]  ;;  %v3096_v5 = vld [vmem:[%s4373_s4] ss:$0 sm:$0xff]  ;;  %s4392_s21 = sld [smem:[#allocation6_spill]] }
   0xc   :  { %3583 = vmatpush3.bf16.msra.mxu0 %v3580_v3  ;;  %vm156_vm1 = vcmask 261120   ;;  %v202_v26 = vld [vmem:[%s4376_s7] sm:$0xff]  ;;  %v204_v27 = vld [vmem:[%s4376_s7 + $0x10] sm:$0xff]  ;;  %v203_v46 = vld [vmem:[%s4376_s7 + $0x8] sm:$0xff]  ;;  %vm509_vm3 = vcmask 64512   ;;  %vm3809_vm4 = vmmov 0  }
   0xd   :  { %3365 = vmatprep.mubr.msk.f32.mxu1 %vm156_vm1, %v204_v27  ;;  %v3099_v36 = vld [vmem:[%s4374_s5] ss:$0 sm:$0xff]  ;;  %vm3951_vm2 = vmpackc.low %vm156_vm1, %vm156_vm1  ;;  %v205_v47 = vld [vmem:[%s4376_s7 + $0x18] sm:$0xff]  ;;  %vm1508_vm6 = vcmask 523264   ;;  %s3811_s3 = smov [#allocation2]  }
   0xe   :  { %v3100_v40 = vld [vmem:[%s4375_s6] ss:$0 sm:$0xff]  ;;  %v207_v49 = vld [vmem:[%s4376_s7 + $0x28] sm:$0xff]  ;;  %v208_v50 = vld [vmem:[%s4376_s7 + $0x30] sm:$0xff]  ;;  %s3085_s20 = sshll.u32 %s3811_s3, 4  ;;  %s3086_s20 = int_to_ptr.vmem [resolvable:$true] %s3085_s20 }
   0xf   :  { %3356 = vmatmul.mubr.msk.f32.vlgmr.msra.gmra.mrb[0].mxu0 %vm68_vm0, %v58_v4  ;;  %v206_v48 = vld [vmem:[%s4376_s7 + $0x20] sm:$0xff]  ;;  %v209_v51 = vld [vmem:[%s4376_s7 + $0x38] sm:$0xff]  ;;  %vm4055_vm5 = vmpackc.low %vm68_vm0, %vm68_vm0  ;;  %p3789_p1 = scmp.lt.s32.totalorder %s3086_s20, %s3086_s20 }
  0x10   :  { %3362 = vmatprep.mubr.msk.f32.mxu0 %vm156_vm1, %v202_v26  ;;  %v210_v4 = vld [vmem:[%s4376_s7 + $0x40] sm:$0xff] }
  0x11   :  { %v150_v8 = vld [vmem:[%s4392_s21] sm:$0xff]  ;;  %v151_v11 = vld [vmem:[%s4392_s21 + $0x8] sm:$0xff]  ;;  %s3784_s21 = scalar_lea.vmem %s3086_s20, 256 }
  0x12   :  { %v3151_v44 = vld [vmem:[%s4376_s7 + $0x80] sm:$0xff]  ;;  %p3785_p0 = scmp.ne.s32.totalorder %s3086_s20, %s3784_s21  ;;  %p3790_p2 = scmp.lt.s32.totalorder %s3784_s21, %s3784_s21 }
  0x14   :  { %p3791_p3 = por %p3790_p2, %p3789_p1 }
  0x16   :  { %p3792_p4 = pnand %p3791_p3, %p3785_p0 }
  0xe2   :  { %v3357_v6 = vpop.f32.mrb[0].mxu0 }
  0xe3   :  { %v141_v7 = vpop.f32.mrb[1].mxu0  ;;  %v147_v9 = vadd.f32 %v3357_v6, %v3096_v5  ;;  %v212_v6 = vld [vmem:[%s4376_s7 + $0x50] sm:$0xff] }
  0xe4   :  { %v142_v10 = vadd.f32 %v3096_v5, %v141_v7  ;;  %v211_v5 = vld [vmem:[%s4376_s7 + $0x48] sm:$0xff]  ;;  %v213_v7 = vld [vmem:[%s4376_s7 + $0x58] sm:$0xff] }
  0xe5   :  { %v153_v14 = vadd.f32 %v151_v11, %v147_v9  ;;  %v4021_v9 = vld [vmem:[%s4371_s2] sm:$0xff] }
  0xe6   :  { %v152_v12 = vadd.f32 %v150_v8, %v142_v10  ;;  %v4016_v8 = vld [vmem:[%s4371_s2 + $0x8] sm:$0xff] }
  0xe7   :  { %v160_v15 = vsel %vm156_vm1, %v153_v14, 0.0 }
  0xe8   :  { %v157_v13 = vsel %vm156_vm1, %v152_v12, 0.0 }
  0xe9   :  { %158 = vadd.xlane.f32.xlu0 %v157_v13 }
  0xed   :  { %161 = vadd.xlane.f32.xlu0 %v160_v15 }
 0x176   :  { %v159_v16 = vpop.xlane.xlu0 %158 }
 0x177   :  { %v164_v17 = vmul.f32 0.03125, %v159_v16 }
 0x179   :  { %v166_v18 = vsub.f32 %v152_v12, %v164_v17 }
 0x17a   :  { %v162_v19 = vpop.xlane.xlu0 %161 }
 0x17b   :  { %v165_v20 = vmul.f32 0.03125, %v162_v19  ;;  %v168_v21 = vmul.f32 %v166_v18, %v166_v18 }
 0x17d   :  { %v167_v22 = vsub.f32 %v153_v14, %v165_v20  ;;  %v170_v23 = vsel %vm156_vm1, %v168_v21, 0.0 }
 0x17e   :  { %171 = vadd.xlane.f32.xlu1 %v170_v23 }
 0x17f   :  { %v169_v24 = vmul.f32 %v167_v22, %v167_v22 }
 0x181   :  { %v173_v25 = vsel %vm156_vm1, %v169_v24, 0.0 }
 0x182   :  { %174 = vadd.xlane.f32.xlu1 %v173_v25 }
 0x20b   :  { %v172_v28 = vpop.xlane.xlu1 %171 }
 0x20c   :  { %v176_v29 = vmul.f32 0.03125, %v172_v28 }
 0x20e   :  { %v178_v30 = vadd.f32 1e-06, %v176_v29 }
 0x20f   :  { %v175_v31 = vpop.xlane.xlu1 %174 }
 0x210   :  { %3700 = vrsqrt.f32 %v178_v30  ;;  %v177_v32 = vmul.f32 0.03125, %v175_v31 }
 0x212   :  { %v179_v33 = vadd.f32 1e-06, %v177_v32 }
 0x214   :  { %3702 = vrsqrt.f32 %v179_v33 }
 0x21a   :  { %v3701_v34 = vpop.eup %3700 }
 0x21b   :  { %v182_v35 = vmul.f32 %v3701_v34, %v166_v18 }
 0x21d   :  { %v190_v39 = vmul.f32 %v3099_v36, %v182_v35 }
 0x21e   :  { %v3703_v37 = vpop.eup %3702 }
 0x21f   :  { %v183_v38 = vmul.f32 %v3703_v37, %v167_v22  ;;  %v3945_v42 = vadd.f32 %v3100_v40, %v190_v39 }
 0x221   :  { %v191_v41 = vmul.f32 %v3099_v36, %v183_v38 }
 0x223   :  { %v3947_v43 = vadd.f32 %v3100_v40, %v191_v41 }
 0x225   :  { %v3584_v45 = vpack.c.bf16 %v3947_v43, %v3945_v42 }
 0x227   :  { %3586 = vmatprep.subr.msk.bf16.mxu0 %vm3951_vm2, %v3584_v45  ;;  %3692 = vmatprep.subr.msk.bf16.mxu1 %vm3951_vm2, %v3584_v45 }
 0x228   :  { %3589 = vmatpush3.bf16.xpose.msk.msra.mxu0 %vm3951_vm2, %v3584_v45  ;;  %3693 = vmatpush3.bf16.xpose.msk.msra.mxu1 %vm3951_vm2, %v3584_v45 }
 0x22f   :  { %3363 = vmatmul.mubr.msk.f32.vlgmr.msra.gmra.mrb[2].mxu0 %vm156_vm1, %v203_v46  ;;  %3366 = vmatmul.mubr.msk.f32.vlgmr.msra.gmra.mrb[0].mxu1 %vm156_vm1, %v205_v47 }
 0x230   :  { %3368 = vmatprep.mubr.msk.f32.mxu1 %vm156_vm1, %v206_v48 }
 0x233   :  { %3369 = vmatmul.mubr.msk.f32.gmra.mrb[2].mxu1 %vm156_vm1, %v207_v49 }
 0x234   :  { %3371 = vmatprep.mubr.msk.f32.mxu1 %vm156_vm1, %v208_v50 }
 0x237   :  { %3372 = vmatmul.mubr.msk.f32.gmra.mrb[4].mxu1 %vm156_vm1, %v209_v51 }
 0x238   :  { %3374 = vmatprep.mubr.msk.f32.mxu1 %vm156_vm1, %v210_v4 }
 0x23b   :  { %3375 = vmatmul.mubr.msk.f32.gmra.mrb[6].mxu1 %vm156_vm1, %v211_v5 }
 0x23c   :  { %3377 = vmatprep.mubr.msk.f32.mxu1 %vm156_vm1, %v212_v6 }
 0x23f   :  { %3378 = vmatmul.mubr.msk.f32.gmra.mrb[8].mxu1 %vm156_vm1, %v213_v7 }
 0x302   :  { %v3364_v52 = vpop.f32.mrb[2].mxu0  ;;  %v3367_v53 = vpop.f32.mrb[0].mxu1 }
 0x303   :  { %413 = vxpose.xlu1.b32.start.end [1/1] (short) (narrow) %v3364_v52, 16  ;;  %v322_v54 = vpop.f32.mrb[3].mxu0  ;;  %v332_v55 = vpop.f32.mrb[1].mxu1 }
 0x304   :  { %381 = vxpose.xlu0.b32.start.end [1/1] (short) (narrow) %v322_v54, 16 }
 0x306   :  { %v3370_v56 = vpop.f32.mrb[2].mxu1 }
 0x307   :  { %v342_v57 = vpop.f32.mrb[3].mxu1 }
 0x308   :  { %3380 = vmatprep.subr.mxu0 %v342_v57 }
 0x309   :  { %445 = vxpose.xlu0.b32.start.end [1/1] (short) (narrow) %v332_v55, 16  ;;  %3381 = vmatpush3.msra.mxu0 %v342_v57 }
 0x30a   :  { %3385 = vmatprep.subr.mxu0 %v3370_v56  ;;  %v3373_v58 = vpop.f32.mrb[4].mxu1 }
 0x30b   :  { %v352_v59 = vpop.f32.mrb[5].mxu1 }
 0x30e   :  { %477 = vxpose.xlu0.b32.start.end [1/1] (short) (narrow) %v3367_v53, 16 }
 0x383   :  { %v429_v61 = vpop.trf.xlu1 }
 0x384   :  { %v397_v60 = vpop.trf.xlu0 }
 0x385   :  { %3382 = vmatprep.mubr.msk.f32.mxu0 %vm509_vm3, %v397_v60 }
 0x387   :  { %v430_v63 = vpop.trf.xlu1 }
 0x388   :  { %v398_v62 = vpop.trf.xlu0 }
 0x389   :  { %3383 = vmatmul.mubr.msk.f32.vlgmr.msra.gmra.mrb[4].mxu0 %vm509_vm3, %v398_v62 }
 0x38a   :  { %3386 = vmatpush3.msra.mxu0 %v3370_v56  ;;  %3387 = vmatprep.mubr.msk.f32.mxu0 %vm509_vm3, %v429_v61 }
 0x38b   :  { %3390 = vmatprep.subr.mxu0 %v352_v59 }
 0x38c   :  { %v461_v0 = vpop.trf.xlu0 }
 0x38d   :  { %3388 = vmatmul.mubr.msk.f32.vlgmr.msra.gmra.mrb[6].mxu0 %vm509_vm3, %v430_v63 }
 0x38e   :  { %3392 = vmatprep.mubr.msk.f32.mxu0 %vm509_vm3, %v461_v0  ;;  %3391 = vmatpush3.msra.mxu0 %v352_v59 }
 0x38f   :  { %3395 = vmatprep.subr.mxu0 %v3373_v58 }
 0x390   :  { %v462_v1 = vpop.trf.xlu0 }
 0x391   :  { %3393 = vmatmul.mubr.msk.f32.vlgmr.msra.gmra.mrb[8].mxu0 %vm509_vm3, %v462_v1 }
 0x392   :  { %3396 = vmatpush3.msra.mxu0 %v3373_v58 }
 0x394   :  { %v493_v2 = vpop.trf.xlu0 }
 0x395   :  { %3397 = vmatprep.mubr.msk.f32.mxu0 %vm509_vm3, %v493_v2 }
 0x398   :  { %v494_v3 = vpop.trf.xlu0 }
 0x399   :  { %3398 = vmatmul.mubr.msk.f32.vlgmr.msra.gmra.mrb[10].mxu0 %vm509_vm3, %v494_v3 }
 0x45c   :  { %v3384_v10 = vpop.f32.mrb[4].mxu0 }
 0x45d   :  { %v588_v11 = vadd.f32 %v3384_v10, %v4016_v8  ;;  %v582_v12 = vpop.f32.mrb[5].mxu0 }
 0x45e   :  { %v583_v13 = vadd.f32 %v582_v12, %v4021_v9 }
 0x45f   :  { %v837_v14 = vsel %vm68_vm0, %v588_v11, -inf }
 0x460   :  { %838 = vmax.xlane.f32.xlu0 %v837_v14  ;;  %v3389_v15 = vpop.f32.mrb[6].mxu0  ;;  %v834_v16 = vsel %vm68_vm0, %v583_v13, -inf }
 0x461   :  { %v669_v17 = vadd.f32 %v3389_v15, %v4016_v8  ;;  %v663_v18 = vpop.f32.mrb[7].mxu0  ;;  %835 = vmax.xlane.f32.xlu1 %v834_v16  ;;  %v3808_v15 = vmov 0.0|0.0   ;;  %v3376_v16 = vpop.f32.mrb[6].mxu1 }
 0x462   :  { %v664_v20 = vadd.f32 %v663_v18, %v4021_v9  ;;  %3590 = vmatprep.subr.bf16.mxu0 %v3808_v15  ;;  %3594 = vmatprep.subr.bf16.mxu1 %v3808_v15  ;;  %v3810_v18 = vmov 0.0  }
 0x463   :  { %v843_v19 = vsel %vm68_vm0, %v669_v17, -inf  ;;  %3404 = vmatprep.mubr.msk.f32.mxu0 %vm3809_vm4, %v3810_v18  ;;  %3411 = vmatprep.mubr.msk.f32.mxu1 %vm3809_vm4, %v3810_v18 }
 0x464   :  { %v3394_v21 = vpop.f32.mrb[8].mxu0  ;;  %v840_v26 = vsel %vm68_vm0, %v664_v20, -inf }
 0x465   :  { %v750_v22 = vadd.f32 %v3394_v21, %v4016_v8  ;;  %844 = vmax.xlane.f32.xlu1 %v843_v19  ;;  %v744_v23 = vpop.f32.mrb[9].mxu0 }
 0x466   :  { %v745_v25 = vadd.f32 %v744_v23, %v4021_v9 }
 0x467   :  { %v849_v24 = vsel %vm68_vm0, %v750_v22, -inf }
 0x468   :  { %850 = vmax.xlane.f32.xlu0 %v849_v24  ;;  %v846_v28 = vsel %vm68_vm0, %v745_v25, -inf }
 0x469   :  { %841 = vmax.xlane.f32.xlu1 %v840_v26 }
 0x46c   :  { %v3399_v27 = vpop.f32.mrb[10].mxu0 }
 0x46d   :  { %v831_v29 = vadd.f32 %v3399_v27, %v4016_v8  ;;  %847 = vmax.xlane.f32.xlu1 %v846_v28  ;;  %v825_v30 = vpop.f32.mrb[11].mxu0 }
 0x46e   :  { %v826_v31 = vadd.f32 %v825_v30, %v4021_v9 }
 0x46f   :  { %v855_v32 = vsel %vm68_vm0, %v831_v29, -inf }
 0x470   :  { %856 = vmax.xlane.f32.xlu0 %v855_v32  ;;  %v852_v33 = vsel %vm68_vm0, %v826_v31, -inf }
 0x471   :  { %853 = vmax.xlane.f32.xlu1 %v852_v33 }
 0x4ed   :  { %v839_v34 = vpop.xlane.xlu0 %838 }
 0x4ee   :  { %v859_v35 = vsub.f32 %v588_v11, %v839_v34  ;;  %v836_v36 = vpop.xlane.xlu1 %835 }
 0x4ef   :  { %v858_v37 = vsub.f32 %v583_v13, %v836_v36 }
 0x4f0   :  { %v868_v38 = vmul.f32 1.442695, %v859_v35 }
 0x4f1   :  { %v866_v39 = vmul.f32 1.442695, %v858_v37 }
 0x4f2   :  { %3704 = vpow2.f32 %v868_v38  ;;  %v845_v40 = vpop.xlane.xlu1 %844 }
 0x4f3   :  { %3706 = vpow2.f32 %v866_v39  ;;  %v861_v41 = vsub.f32 %v669_v17, %v845_v40  ;;  %v362_v17 = vpop.f32.mrb[7].mxu1 }
 0x4f4   :  { %v3379_v19 = vpop.f32.mrb[8].mxu1 }
 0x4f5   :  { %v872_v45 = vmul.f32 1.442695, %v861_v41  ;;  %v851_v46 = vpop.xlane.xlu0 %850 }
 0x4f6   :  { %v863_v47 = vsub.f32 %v750_v22, %v851_v46  ;;  %v842_v48 = vpop.xlane.xlu1 %841 }
 0x4f7   :  { %3708 = vpow2.f32 %v872_v45  ;;  %v860_v49 = vsub.f32 %v664_v20, %v842_v48  ;;  %v372_v20 = vpop.f32.mrb[9].mxu1 }
 0x4f8   :  { %v876_v50 = vmul.f32 1.442695, %v863_v47 }
 0x4f9   :  { %v870_v51 = vmul.f32 1.442695, %v860_v49 }
 0x4fa   :  { %3710 = vpow2.f32 %v876_v50  ;;  %v848_v52 = vpop.xlane.xlu1 %847 }
 0x4fb   :  { %3712 = vpow2.f32 %v870_v51  ;;  %v862_v53 = vsub.f32 %v745_v25, %v848_v52 }
 0x4fc   :  { %v3705_v54 = vpop.eup %3704 }
 0x4fd   :  { %v3707_v55 = vpop.eup %3706  ;;  %v874_v56 = vmul.f32 1.442695, %v862_v53  ;;  %v857_v57 = vpop.xlane.xlu0 %856  ;;  %v885_v58 = vsel %vm68_vm0, %v3705_v54, 0.0  ;;  %v1270_v53 = vld [vmem:[%s4377_s8] sm:$0xff] }
 0x4fe   :  { %v865_v59 = vsub.f32 %v831_v29, %v857_v57  ;;  %v854_v60 = vpop.xlane.xlu1 %853  ;;  %886 = vadd.xlane.f32.xlu0 %v885_v58  ;;  %v882_v61 = vsel %vm68_vm0, %v3707_v55, 0.0  ;;  %v1272_v58 = vld [vmem:[%s4377_s8 + $0x10] sm:$0xff] }
 0x4ff   :  { %3714 = vpow2.f32 %v874_v56  ;;  %v864_v62 = vsub.f32 %v826_v31, %v854_v60  ;;  %883 = vadd.xlane.f32.xlu1 %v882_v61  ;;  %v3195_v31 = vld [vmem:[%s4377_s8 + $0x30] sm:$0xff] }
 0x500   :  { %v880_v63 = vmul.f32 1.442695, %v865_v59  ;;  %v1273_v59 = vld [vmem:[%s4377_s8 + $0x18] sm:$0xff] }
 0x501   :  { %v3709_v0 = vpop.eup %3708  ;;  %v878_v1 = vmul.f32 1.442695, %v864_v62  ;;  %v3610_v60 = vpack.c.bf16 %v1273_v59, %v1272_v58  ;;  %v1499_v58 = vld [vmem:[%s4382_s13 + $0x30] sm:$0xff]  ;;  %v1500_v59 = vld [vmem:[%s4382_s13 + $0x38] sm:$0xff] }
 0x502   :  { %3716 = vpow2.f32 %v880_v63  ;;  %v891_v2 = vsel %vm68_vm0, %v3709_v0, 0.0 }
 0x503   :  { %3718 = vpow2.f32 %v878_v1  ;;  %892 = vadd.xlane.f32.xlu0 %v891_v2 }
 0x504   :  { %v3711_v3 = vpop.eup %3710 }
 0x505   :  { %v3713_v4 = vpop.eup %3712  ;;  %v897_v5 = vsel %vm68_vm0, %v3711_v3, 0.0 }
 0x506   :  { %v888_v6 = vsel %vm68_vm0, %v3713_v4, 0.0 }
 0x507   :  { %889 = vadd.xlane.f32.xlu1 %v888_v6  ;;  %898 = vadd.xlane.f32.xlu0 %v897_v5 }
 0x509   :  { %v3715_v7 = vpop.eup %3714 }
 0x50a   :  { %v894_v10 = vsel %vm68_vm0, %v3715_v7, 0.0 }
 0x50b   :  { %895 = vadd.xlane.f32.xlu1 %v894_v10 }
 0x50c   :  { %v3717_v11 = vpop.eup %3716 }
 0x50d   :  { %v3719_v12 = vpop.eup %3718  ;;  %v903_v13 = vsel %vm68_vm0, %v3717_v11, 0.0 }
 0x50e   :  { %904 = vadd.xlane.f32.xlu0 %v903_v13  ;;  %v900_v14 = vsel %vm68_vm0, %v3719_v12, 0.0 }
 0x50f   :  { %901 = vadd.xlane.f32.xlu1 %v900_v14 }
 0x58b   :  { %v887_v21 = vpop.xlane.xlu0 %886 }
 0x58c   :  { %3720 = vrcp.f32 %v887_v21  ;;  %v884_v22 = vpop.xlane.xlu1 %883 }
 0x58d   :  { %3722 = vrcp.f32 %v884_v22 }
 0x590   :  { %v893_v23 = vpop.xlane.xlu0 %892 }
 0x591   :  { %3724 = vrcp.f32 %v893_v23 }
 0x594   :  { %v890_v24 = vpop.xlane.xlu1 %889  ;;  %v899_v25 = vpop.xlane.xlu0 %898 }
 0x595   :  { %3726 = vrcp.f32 %v890_v24  ;;  %v1400_v24 = vld [vmem:[%s4380_s11 + $0x8] sm:$0xff] }
 0x596   :  { %v3721_v26 = vpop.eup %3720  ;;  %3728 = vrcp.f32 %v899_v25 }
 0x597   :  { %v3723_v27 = vpop.eup %3722  ;;  %v909_v28 = vmul.f32 %v3721_v26, %v3705_v54  ;;  %v1271_v54 = vld [vmem:[%s4377_s8 + $0x8] sm:$0xff]  ;;  %v1401_v26 = vld [vmem:[%s4380_s11 + $0x10] sm:$0xff] }
 0x598   :  { %v907_v29 = vmul.f32 %v3723_v27, %v3707_v55  ;;  %v896_v30 = vpop.xlane.xlu1 %895  ;;  %v3606_v55 = vpack.c.bf16 %v1271_v54, %v1270_v53  ;;  %v1402_v27 = vld [vmem:[%s4380_s11 + $0x18] sm:$0xff] }
 0x599   :  { %3730 = vrcp.f32 %v896_v30  ;;  %v1494_v30 = vld [vmem:[%s4382_s13 + $0x8] sm:$0xff] }
 0x59a   :  { %v3591_v32 = vpack.c.bf16 %v909_v28, %v907_v29  ;;  %v3618_v28 = vpack.c.bf16 %v1402_v27, %v1401_v26  ;;  %v1493_v29 = vld [vmem:[%s4382_s13] sm:$0xff] }
 0x59b   :  { %v905_v33 = vpop.xlane.xlu0 %904  ;;  %v3725_v35 = vpop.eup %3724 }
 0x59c   :  { %3732 = vrcp.f32 %v905_v33  ;;  %v902_v34 = vpop.xlane.xlu1 %901  ;;  %3593 = vmatpush3.bf16.xpose.msk.msra.mxu0 %vm4055_vm5, %v3591_v32  ;;  %v913_v37 = vmul.f32 %v3725_v35, %v3709_v0  ;;  %v1495_v32 = vld [vmem:[%s4382_s13 + $0x10] sm:$0xff]  ;;  %v3622_v33 = vpack.c.bf16 %v1494_v30, %v1493_v29 }
 0x59d   :  { %3734 = vrcp.f32 %v902_v34  ;;  %3598 = vmatprep.subr.bf16.mxu0 %v3808_v15  ;;  %v1496_v34 = vld [vmem:[%s4382_s13 + $0x18] sm:$0xff] }
 0x59e   :  { %v3626_v35 = vpack.c.bf16 %v1496_v34, %v1495_v32 }
 0x59f   :  { %v3727_v36 = vpop.eup %3726 }
 0x5a0   :  { %v911_v38 = vmul.f32 %v3727_v36, %v3713_v4  ;;  %v3729_v39 = vpop.eup %3728  ;;  %v1497_v36 = vld [vmem:[%s4382_s13 + $0x20] sm:$0xff] }
 0x5a1   :  { %v917_v45 = vmul.f32 %v3729_v39, %v3711_v3 }
 0x5a2   :  { %v3595_v40 = vpack.c.bf16 %v913_v37, %v911_v38  ;;  %v1498_v37 = vld [vmem:[%s4382_s13 + $0x28] sm:$0xff] }
 0x5a3   :  { %v3731_v41 = vpop.eup %3730  ;;  %3405 = vmatmul.mubr.msk.f32.vlgmr.msra.gmra.mrb[12].mxu0 %vm68_vm0, %v362_v17  ;;  %v3630_v38 = vpack.c.bf16 %v1498_v37, %v1497_v36 }
 0x5a4   :  { %v915_v46 = vmul.f32 %v3731_v41, %v3715_v7  ;;  %3597 = vmatpush3.bf16.xpose.msk.msra.mxu1 %vm4055_vm5, %v3595_v40  ;;  %3418 = vmatprep.mubr.msk.f32.mxu0 %vm3809_vm4, %v3810_v18 }
 0x5a5   :  { %3602 = vmatprep.subr.bf16.mxu1 %v3808_v15 }
 0x5a6   :  { %v3733_v47 = vpop.eup %3732  ;;  %v3599_v48 = vpack.c.bf16 %v917_v45, %v915_v46 }
 0x5a7   :  { %v3735_v49 = vpop.eup %3734  ;;  %v921_v50 = vmul.f32 %v3733_v47, %v3717_v11 }
 0x5a8   :  { %v919_v51 = vmul.f32 %v3735_v49, %v3719_v12  ;;  %3601 = vmatpush3.bf16.xpose.msk.msra.mxu0 %vm4055_vm5, %v3599_v48  ;;  %v3137_v49 = vld [vmem:[%s4378_s9] ss:$0 sm:$0xff] }
 0x5a9   :  { %3607 = vmatprep.subr.bf16.mxu0 %v3606_v55 }
 0x5aa   :  { %v3603_v52 = vpack.c.bf16 %v921_v50, %v919_v51  ;;  %v3138_v51 = vld [vmem:[%s4379_s10] ss:$0 sm:$0xff] }
 0x5ab   :  { %3412 = vmatmul.mubr.msk.f32.vlgmr.msra.gmra.mrb[10].mxu1 %vm68_vm0, %v3376_v16 }
 0x5ac   :  { %3605 = vmatpush3.bf16.xpose.msk.msra.mxu1 %vm4055_vm5, %v3603_v52  ;;  %3425 = vmatprep.mubr.msk.f32.mxu1 %vm3809_vm4, %v3810_v18 }
 0x5af   :  { %3419 = vmatmul.mubr.msk.f32.vlgmr.msra.gmra.mrb[14].mxu0 %vm68_vm0, %v372_v20 }
 0x5b0   :  { %3609 = vmatpush3.bf16.msra.mxu0 %v3606_v55 }
 0x5b1   :  { %3611 = vmatprep.subr.bf16.mxu0 %v3610_v60 }
 0x5b3   :  { %3426 = vmatmul.mubr.msk.f32.vlgmr.msra.gmra.mrb[12].mxu1 %vm68_vm0, %v3379_v19 }
 0x5b4   :  { %3613 = vmatpush3.bf16.msra.mxu0 %v3610_v60  ;;  %v3634_v60 = vpack.c.bf16 %v1500_v59, %v1499_v58 }
 0x5b5   :  { %3623 = vmatprep.subr.bf16.mxu0 %v3622_v33 }
 0x676   :  { %v997_v56 = vpop.f32.mrb[12].mxu0 }
 0x677   :  { %v3406_v57 = vpop.f32.mrb[13].mxu0  ;;  %1238 = vxpose.xlu1.b32.start [1/4] (short) (narrow) %v997_v56, 16 }
 0x67e   :  { %v1076_v61 = vpop.f32.mrb[10].mxu1 }
 0x67f   :  { %1239 = vxpose.xlu1.b32.cont [2/4] (short) (narrow) %v1076_v61, 16  ;;  %v3413_v62 = vpop.f32.mrb[11].mxu1  ;;  %v3139_v61 = vld [vmem:[%s4381_s12] ss:$0 sm:$0xff] }
 0x682   :  { %v1155_v63 = vpop.f32.mrb[14].mxu0 }
 0x683   :  { %1240 = vxpose.xlu1.b32.cont [3/4] (short) (narrow) %v1155_v63, 16  ;;  %v3420_v0 = vpop.f32.mrb[15].mxu0 }
 0x686   :  { %v1234_v1 = vpop.f32.mrb[12].mxu1 }
 0x687   :  { %1241 = vxpose.xlu1.b32.end [4/4] (short) (narrow) %v1234_v1, 16  ;;  %v3427_v2 = vpop.f32.mrb[13].mxu1 }
 0x6fb   :  { %v1254_v3 = vpop.trf.xlu1 }
 0x6fc   :  { %3436 = vmatprep.mubr.msk.f32.mxu0 %vm156_vm1, %v1254_v3 }
 0x6ff   :  { %v1255_v4 = vpop.trf.xlu1 }
 0x700   :  { %3437 = vmatmul.mubr.msk.f32.vlgmr.msra.gmra.mrb[16].mxu0 %vm156_vm1, %v1255_v4  ;;  %v3142_v4 = vld [vmem:[%s4383_s14] ss:$0 sm:$0xff] }
 0x701   :  { %3625 = vmatpush3.bf16.msra.mxu0 %v3622_v33 }
 0x702   :  { %3627 = vmatprep.subr.bf16.mxu0 %v3626_v35 }
 0x705   :  { %3629 = vmatpush3.bf16.msra.mxu0 %v3626_v35  ;;  %v3145_v35 = vld [vmem:[%s4384_s15] ss:$0 sm:$0xff] }
 0x706   :  { %3631 = vmatprep.subr.bf16.mxu0 %v3630_v38 }
 0x709   :  { %3633 = vmatpush3.bf16.msra.mxu0 %v3630_v38 }
 0x70a   :  { %3635 = vmatprep.subr.bf16.mxu0 %v3634_v60 }
 0x70d   :  { %3637 = vmatpush3.bf16.msra.mxu0 %v3634_v60 }
 0x7d3   :  { %v3438_v5 = vpop.f32.mrb[16].mxu0 }
 0x7d4   :  { %v1346_v6 = vpop.f32.mrb[17].mxu0  ;;  %v1352_v10 = vadd.f32 %v3438_v5, %v3947_v43  ;;  %v1399_v43 = vld [vmem:[%s4380_s11] sm:$0xff] }
 0x7d5   :  { %v1347_v7 = vadd.f32 %v1346_v6, %v3945_v42  ;;  %v3614_v25 = vpack.c.bf16 %v1400_v24, %v1399_v43 }
 0x7d6   :  { %v1360_v12 = vsel %vm156_vm1, %v1352_v10, 0.0 }
 0x7d7   :  { %v1357_v11 = vsel %vm156_vm1, %v1347_v7, 0.0  ;;  %3615 = vmatprep.subr.bf16.mxu1 %v3614_v25 }
 0x7d8   :  { %1358 = vadd.xlane.f32.xlu0 %v1357_v11  ;;  %3617 = vmatpush3.bf16.msra.mxu1 %v3614_v25  ;;  %v3147_v25 = vld [vmem:[%s4376_s7 + $0x60] sm:$0xff] }
 0x7d9   :  { %3619 = vmatprep.subr.bf16.mxu1 %v3618_v28 }
 0x7dc   :  { %1361 = vadd.xlane.f32.xlu0 %v1360_v12  ;;  %3621 = vmatpush3.bf16.msra.mxu1 %v3618_v28 }
 0x865   :  { %v1359_v13 = vpop.xlane.xlu0 %1358 }
 0x866   :  { %v1363_v14 = vmul.f32 0.03125, %v1359_v13 }
 0x868   :  { %v1365_v16 = vsub.f32 %v1347_v7, %v1363_v14 }
 0x869   :  { %v1362_v17 = vpop.xlane.xlu0 %1361 }
 0x86a   :  { %v1364_v19 = vmul.f32 0.03125, %v1362_v17  ;;  %v1367_v20 = vmul.f32 %v1365_v16, %v1365_v16 }
 0x86c   :  { %v1366_v21 = vsub.f32 %v1352_v10, %v1364_v19  ;;  %v1369_v22 = vsel %vm156_vm1, %v1367_v20, 0.0 }
 0x86d   :  { %1370 = vadd.xlane.f32.xlu0 %v1369_v22 }
 0x86e   :  { %v1368_v23 = vmul.f32 %v1366_v21, %v1366_v21 }
 0x870   :  { %v1372_v42 = vsel %vm156_vm1, %v1368_v23, 0.0 }
 0x871   :  { %1373 = vadd.xlane.f32.xlu0 %v1372_v42 }
 0x8fa   :  { %v1371_v39 = vpop.xlane.xlu0 %1370 }
 0x8fb   :  { %v1375_v40 = vmul.f32 0.03125, %v1371_v39  ;;  %v3146_v39 = vld [vmem:[%s4385_s16] ss:$0 sm:$0xff] }
 0x8fd   :  { %v1377_v41 = vadd.f32 1e-06, %v1375_v40 }
 0x8fe   :  { %v1374_v45 = vpop.xlane.xlu0 %1373 }
 0x8ff   :  { %3736 = vrsqrt.f32 %v1377_v41  ;;  %v1376_v46 = vmul.f32 0.03125, %v1374_v45 }
 0x901   :  { %v1378_v47 = vadd.f32 1e-06, %v1376_v46 }
 0x903   :  { %3738 = vrsqrt.f32 %v1378_v47  ;;  %v3148_v47 = vld [vmem:[%s4376_s7 + $0x68] sm:$0xff] }
 0x909   :  { %v3737_v48 = vpop.eup %3736 }
 0x90a   :  { %v1381_v50 = vmul.f32 %v3737_v48, %v1365_v16  ;;  %v3149_v48 = vld [vmem:[%s4376_s7 + $0x70] sm:$0xff] }
 0x90c   :  { %v1389_v52 = vmul.f32 %v3137_v49, %v1381_v50  ;;  %v3152_v50 = vld [vmem:[%s4376_s7 + $0x88] sm:$0xff] }
 0x90d   :  { %v3739_v53 = vpop.eup %3738 }
 0x90e   :  { %v1382_v54 = vmul.f32 %v3739_v53, %v1366_v21  ;;  %v1397_v55 = vadd.f32 %v3138_v51, %v1389_v52  ;;  %v3154_v52 = vld [vmem:[%s4376_s7 + $0x98] sm:$0xff] }
 0x910   :  { %v1390_v56 = vmul.f32 %v3137_v49, %v1382_v54  ;;  %3447 = vmatprep.mubr.msk.f32.mxu1 %vm156_vm1, %v1397_v55  ;;  %v3150_v49 = vld [vmem:[%s4376_s7 + $0x78] sm:$0xff] }
 0x912   :  { %v1398_v57 = vadd.f32 %v3138_v51, %v1390_v56  ;;  %v3153_v51 = vld [vmem:[%s4376_s7 + $0x90] sm:$0xff] }
 0x914   :  { %3448 = vmatmul.mubr.msk.f32.vlgmr.msra.gmra.mrb[14].mxu1 %vm156_vm1, %v1398_v57 }
 0x915   :  { %3473 = vmatprep.mubr.msk.f32.mxu1 %vm156_vm1, %v3147_v25 }
 0x9e7   :  { %v3449_v62 = vpop.f32.mrb[14].mxu1 }
 0x9e8   :  { %v1488_v63 = vadd.f32 %v3449_v62, %v3139_v61  ;;  %v1482_v0 = vpop.f32.mrb[15].mxu1 }
 0x9e9   :  { %v1483_v1 = vadd.f32 %v3139_v61, %v1482_v0 }
 0x9ea   :  { %v1492_v3 = vmax.f32 %v1488_v63, 0.0 }
 0x9eb   :  { %v1491_v2 = vmax.f32 %v1483_v1, 0.0 }
 0x9ed   :  { %3466 = vmatprep.mubr.msk.f32.mxu0 %vm1508_vm6, %v1491_v2 }
 0x9ee   :  { %3467 = vmatmul.mubr.msk.f32.vlgmr.msra.gmra.mrb[18].mxu0 %vm1508_vm6, %v1492_v3 }
 0xac1   :  { %v3468_v5 = vpop.f32.mrb[18].mxu0 }
 0xac2   :  { %v1581_v6 = vpop.f32.mrb[19].mxu0  ;;  %v1587_v7 = vadd.f32 %v3468_v5, %v3142_v4  ;;  %v3155_v5 = vld [vmem:[%s4376_s7 + $0xa0] sm:$0xff] }
 0xac3   :  { %v1582_v10 = vadd.f32 %v3142_v4, %v1581_v6  ;;  %v3156_v6 = vld [vmem:[%s4376_s7 + $0xa8] sm:$0xff] }
 0xac4   :  { %v1591_v13 = vadd.f32 %v1587_v7, %v1398_v57  ;;  %v3157_v7 = vld [vmem:[%s4376_s7 + $0xb0] sm:$0xff] }
 0xac5   :  { %v1590_v11 = vadd.f32 %v1582_v10, %v1397_v55  ;;  %v3158_v10 = vld [vmem:[%s4376_s7 + $0xb8] sm:$0xff] }
 0xac6   :  { %v1597_v14 = vsel %vm156_vm1, %v1591_v13, 0.0 }
 0xac7   :  { %v1594_v12 = vsel %vm156_vm1, %v1590_v11, 0.0 }
 0xac8   :  { %1595 = vadd.xlane.f32.xlu0 %v1594_v12 }
 0xacc   :  { %1598 = vadd.xlane.f32.xlu0 %v1597_v14 }
 0xb55   :  { %v1596_v16 = vpop.xlane.xlu0 %1595 }
 0xb56   :  { %v1600_v17 = vmul.f32 0.03125, %v1596_v16 }
 0xb58   :  { %v1602_v19 = vsub.f32 %v1590_v11, %v1600_v17 }
 0xb59   :  { %v1599_v20 = vpop.xlane.xlu0 %1598 }
 0xb5a   :  { %v1601_v21 = vmul.f32 0.03125, %v1599_v20  ;;  %v1604_v22 = vmul.f32 %v1602_v19, %v1602_v19 }
 0xb5c   :  { %v1603_v23 = vsub.f32 %v1591_v13, %v1601_v21  ;;  %v1606_v42 = vsel %vm156_vm1, %v1604_v22, 0.0 }
 0xb5d   :  { %1607 = vadd.xlane.f32.xlu0 %v1606_v42 }
 0xb5e   :  { %v1605_v43 = vmul.f32 %v1603_v23, %v1603_v23 }
 0xb60   :  { %v1609_v24 = vsel %vm156_vm1, %v1605_v43, 0.0 }
 0xb61   :  { %1610 = vadd.xlane.f32.xlu0 %v1609_v24 }
 0xbea   :  { %v1608_v26 = vpop.xlane.xlu0 %1607 }
 0xbeb   :  { %v1612_v27 = vmul.f32 0.03125, %v1608_v26 }
 0xbed   :  { %v1614_v28 = vadd.f32 1e-06, %v1612_v27 }
 0xbee   :  { %v1611_v29 = vpop.xlane.xlu0 %1610 }
 0xbef   :  { %3740 = vrsqrt.f32 %v1614_v28  ;;  %v1613_v30 = vmul.f32 0.03125, %v1611_v29 }
 0xbf1   :  { %v1615_v32 = vadd.f32 1e-06, %v1613_v30 }
 0xbf3   :  { %3742 = vrsqrt.f32 %v1615_v32 }
 0xbf9   :  { %v3741_v33 = vpop.eup %3740 }
 0xbfa   :  { %v1618_v34 = vmul.f32 %v3741_v33, %v1602_v19 }
 0xbfc   :  { %v1626_v38 = vmul.f32 %v3145_v35, %v1618_v34 }
 0xbfd   :  { %v3743_v36 = vpop.eup %3742 }
 0xbfe   :  { %v1619_v37 = vmul.f32 %v3743_v36, %v1603_v23  ;;  %v4163_v41 = vadd.f32 %v3146_v39, %v1626_v38 }
 0xc00   :  { %v1627_v40 = vmul.f32 %v3145_v35, %v1619_v37 }
 0xc02   :  { %v4165_v45 = vadd.f32 %v3146_v39, %v1627_v40 }
 0xc04   :  { %v3638_v46 = vpack.c.bf16 %v4165_v45, %v4163_v41 }
 0xc06   :  { %3640 = vmatprep.subr.msk.bf16.mxu1 %vm3951_vm2, %v3638_v46 }
 0xc07   :  { %3643 = vmatpush3.bf16.xpose.msk.msra.mxu1 %vm3951_vm2, %v3638_v46 }
 0xc08   :  { %3644 = vmatprep.subr.bf16.mxu1 %v3808_v15 }
 0xc0e   :  { %3474 = vmatmul.mubr.msk.f32.vlgmr.msra.gmra.mrb[16].mxu1 %vm156_vm1, %v3148_v47 }
 0xc0f   :  { %3476 = vmatprep.mubr.msk.f32.mxu1 %vm156_vm1, %v3149_v48 }
 0xc12   :  { %3477 = vmatmul.mubr.msk.f32.gmra.mrb[18].mxu1 %vm156_vm1, %v3150_v49 }
 0xc13   :  { %3479 = vmatprep.mubr.msk.f32.mxu1 %vm156_vm1, %v3151_v44 }
 0xc16   :  { %3480 = vmatmul.mubr.msk.f32.gmra.mrb[20].mxu1 %vm156_vm1, %v3152_v50 }
 0xc17   :  { %3482 = vmatprep.mubr.msk.f32.mxu1 %vm156_vm1, %v3153_v51 }
 0xc1a   :  { %3483 = vmatmul.mubr.msk.f32.gmra.mrb[22].mxu1 %vm156_vm1, %v3154_v52 }
 0xc1b   :  { %3485 = vmatprep.mubr.msk.f32.mxu1 %vm156_vm1, %v3155_v5 }
 0xc1e   :  { %3486 = vmatmul.mubr.msk.f32.gmra.mrb[24].mxu1 %vm156_vm1, %v3156_v6 }
 0xc1f   :  { %3488 = vmatprep.mubr.msk.f32.mxu1 %vm156_vm1, %v3157_v7 }
 0xc22   :  { %3489 = vmatmul.mubr.msk.f32.gmra.mrb[26].mxu1 %vm156_vm1, %v3158_v10 }
 0xc23   :  { %3515 = vmatprep.mubr.msk.f32.mxu1 %vm3809_vm4, %v3810_v18 }
 0xce1   :  { %v3475_v53 = vpop.f32.mrb[16].mxu1 }
 0xce2   :  { %1848 = vxpose.xlu1.b32.start.end [1/1] (short) (narrow) %v3475_v53, 16  ;;  %v1757_v54 = vpop.f32.mrb[17].mxu1 }
 0xce3   :  { %1816 = vxpose.xlu0.b32.start.end [1/1] (short) (narrow) %v1757_v54, 16 }
 0xce5   :  { %v3478_v55 = vpop.f32.mrb[18].mxu1 }
 0xce6   :  { %v1767_v56 = vpop.f32.mrb[19].mxu1 }
 0xce7   :  { %1880 = vxpose.xlu1.b32.start.end [1/1] (short) (narrow) %v1767_v56, 16 }
 0xce9   :  { %v3481_v57 = vpop.f32.mrb[20].mxu1 }
 0xcea   :  { %v1777_v58 = vpop.f32.mrb[21].mxu1 }
 0xceb   :  { %3491 = vmatprep.subr.mxu0 %v1777_v58 }
 0xcec   :  { %1912 = vxpose.xlu1.b32.start.end [1/1] (short) (narrow) %v3478_v55, 16  ;;  %3492 = vmatpush3.msra.mxu0 %v1777_v58 }
 0xced   :  { %3496 = vmatprep.subr.mxu0 %v3481_v57  ;;  %v3484_v59 = vpop.f32.mrb[22].mxu1 }
 0xcee   :  { %v1787_v60 = vpop.f32.mrb[23].mxu1 }
 0xd62   :  { %v1864_v61 = vpop.trf.xlu1 }
 0xd63   :  { %v1832_v62 = vpop.trf.xlu0 }
 0xd64   :  { %3493 = vmatprep.mubr.msk.f32.mxu0 %vm509_vm3, %v1832_v62 }
 0xd66   :  { %v1865_v63 = vpop.trf.xlu1 }
 0xd67   :  { %v1833_v0 = vpop.trf.xlu0 }
 0xd68   :  { %3494 = vmatmul.mubr.msk.f32.vlgmr.msra.gmra.mrb[20].mxu0 %vm509_vm3, %v1833_v0 }
 0xd69   :  { %3497 = vmatpush3.msra.mxu0 %v3481_v57  ;;  %3498 = vmatprep.mubr.msk.f32.mxu0 %vm509_vm3, %v1864_v61 }
 0xd6a   :  { %v1896_v1 = vpop.trf.xlu1  ;;  %3501 = vmatprep.subr.mxu0 %v1787_v60 }
 0xd6c   :  { %3499 = vmatmul.mubr.msk.f32.vlgmr.msra.gmra.mrb[22].mxu0 %vm509_vm3, %v1865_v63 }
 0xd6d   :  { %3502 = vmatpush3.msra.mxu0 %v1787_v60  ;;  %3503 = vmatprep.mubr.msk.f32.mxu0 %vm509_vm3, %v1896_v1 }
 0xd6e   :  { %v1897_v2 = vpop.trf.xlu1  ;;  %3506 = vmatprep.subr.mxu0 %v3484_v59 }
 0xd70   :  { %3504 = vmatmul.mubr.msk.f32.vlgmr.msra.gmra.mrb[24].mxu0 %vm509_vm3, %v1897_v2 }
 0xd71   :  { %3507 = vmatpush3.msra.mxu0 %v3484_v59 }
 0xd72   :  { %v1928_v3 = vpop.trf.xlu1  ;;  %3648 = vmatprep.subr.bf16.mxu0 %v3808_v15 }
 0xd73   :  { %3508 = vmatprep.mubr.msk.f32.mxu0 %vm509_vm3, %v1928_v3 }
 0xd76   :  { %v1929_v4 = vpop.trf.xlu1 }
 0xd77   :  { %3509 = vmatmul.mubr.msk.f32.vlgmr.msra.gmra.mrb[26].mxu0 %vm509_vm3, %v1929_v4 }
 0xd78   :  { %3522 = vmatprep.mubr.msk.f32.mxu0 %vm3809_vm4, %v3810_v18 }
 0xe3b   :  { %v3495_v11 = vpop.f32.mrb[20].mxu0 }
 0xe3c   :  { %v2022_v12 = vadd.f32 %v3495_v11, %v4016_v8  ;;  %v2016_v13 = vpop.f32.mrb[21].mxu0 }
 0xe3d   :  { %v2017_v14 = vadd.f32 %v2016_v13, %v4021_v9 }
 0xe3e   :  { %v2271_v16 = vsel %vm68_vm0, %v2022_v12, -inf }
 0xe3f   :  { %2272 = vmax.xlane.f32.xlu0 %v2271_v16  ;;  %v3500_v17 = vpop.f32.mrb[22].mxu0  ;;  %v2268_v19 = vsel %vm68_vm0, %v2017_v14, -inf }
 0xe40   :  { %v2103_v20 = vadd.f32 %v3500_v17, %v4016_v8  ;;  %2269 = vmax.xlane.f32.xlu1 %v2268_v19  ;;  %v2097_v21 = vpop.f32.mrb[23].mxu0  ;;  %v3487_v17 = vpop.f32.mrb[24].mxu1 }
 0xe41   :  { %v2098_v23 = vadd.f32 %v2097_v21, %v4021_v9  ;;  %v1797_v19 = vpop.f32.mrb[25].mxu1 }
 0xe42   :  { %v2277_v22 = vsel %vm68_vm0, %v2103_v20, -inf }
 0xe43   :  { %v3505_v42 = vpop.f32.mrb[24].mxu0  ;;  %v2274_v26 = vsel %vm68_vm0, %v2098_v23, -inf }
 0xe44   :  { %2278 = vmax.xlane.f32.xlu1 %v2277_v22  ;;  %v2178_v43 = vpop.f32.mrb[25].mxu0  ;;  %v2184_v25 = vadd.f32 %v3505_v42, %v4016_v8 }
 0xe45   :  { %v2179_v24 = vadd.f32 %v2178_v43, %v4021_v9 }
 0xe46   :  { %v2283_v32 = vsel %vm68_vm0, %v2184_v25, -inf }
 0xe47   :  { %v2280_v27 = vsel %vm68_vm0, %v2179_v24, -inf }
 0xe48   :  { %2275 = vmax.xlane.f32.xlu1 %v2274_v26  ;;  %2281 = vmax.xlane.f32.xlu0 %v2280_v27 }
 0xe4a   :  { %v3510_v28 = vpop.f32.mrb[26].mxu0 }
 0xe4b   :  { %v2265_v29 = vadd.f32 %v3510_v28, %v4016_v8  ;;  %v2259_v30 = vpop.f32.mrb[27].mxu0 }
 0xe4c   :  { %v2260_v33 = vadd.f32 %v2259_v30, %v4021_v9  ;;  %2284 = vmax.xlane.f32.xlu1 %v2283_v32 }
 0xe4d   :  { %v2289_v34 = vsel %vm68_vm0, %v2265_v29, -inf }
 0xe4e   :  { %v2286_v35 = vsel %vm68_vm0, %v2260_v33, -inf }
 0xe4f   :  { %2287 = vmax.xlane.f32.xlu0 %v2286_v35 }
 0xe50   :  { %2290 = vmax.xlane.f32.xlu1 %v2289_v34 }
 0xecc   :  { %v2273_v36 = vpop.xlane.xlu0 %2272 }
 0xecd   :  { %v2293_v37 = vsub.f32 %v2022_v12, %v2273_v36  ;;  %v2270_v38 = vpop.xlane.xlu1 %2269 }
 0xece   :  { %v2292_v39 = vsub.f32 %v2017_v14, %v2270_v38 }
 0xecf   :  { %v2302_v40 = vmul.f32 1.442695, %v2293_v37 }
 0xed0   :  { %v2300_v46 = vmul.f32 1.442695, %v2292_v39 }
 0xed1   :  { %3744 = vpow2.f32 %v2302_v40  ;;  %v2279_v8 = vpop.xlane.xlu1 %2278 }
 0xed2   :  { %3746 = vpow2.f32 %v2300_v46  ;;  %v2295_v47 = vsub.f32 %v2103_v20, %v2279_v8  ;;  %v3490_v20 = vpop.f32.mrb[26].mxu1 }
 0xed3   :  { %v1807_v21 = vpop.f32.mrb[27].mxu1 }
 0xed4   :  { %v2306_v48 = vmul.f32 1.442695, %v2295_v47 }
 0xed5   :  { %v2276_v49 = vpop.xlane.xlu1 %2275  ;;  %v2282_v9 = vpop.xlane.xlu0 %2281 }
 0xed6   :  { %3748 = vpow2.f32 %v2306_v48  ;;  %v2294_v44 = vsub.f32 %v2098_v23, %v2276_v49  ;;  %v2296_v50 = vsub.f32 %v2179_v24, %v2282_v9 }
 0xed8   :  { %v2304_v51 = vmul.f32 1.442695, %v2294_v44  ;;  %v2308_v52 = vmul.f32 1.442695, %v2296_v50 }
 0xed9   :  { %v2285_v53 = vpop.xlane.xlu1 %2284 }
 0xeda   :  { %3750 = vpow2.f32 %v2304_v51  ;;  %v2297_v54 = vsub.f32 %v2184_v25, %v2285_v53  ;;  %v3194_v51 = vld [vmem:[%s4377_s8 + $0x28] sm:$0xff] }
 0xedb   :  { %v3745_v55 = vpop.eup %3744  ;;  %3752 = vpow2.f32 %v2308_v52 }
 0xedc   :  { %v3747_v56 = vpop.eup %3746  ;;  %v2310_v57 = vmul.f32 1.442695, %v2297_v54  ;;  %v2288_v58 = vpop.xlane.xlu0 %2287  ;;  %v2319_v59 = vsel %vm68_vm0, %v3745_v55, 0.0  ;;  %v3196_v54 = vld [vmem:[%s4377_s8 + $0x38] sm:$0xff] }
 0xedd   :  { %v2298_v60 = vsub.f32 %v2260_v33, %v2288_v58  ;;  %2320 = vadd.xlane.f32.xlu1 %v2319_v59  ;;  %v2291_v61 = vpop.xlane.xlu1 %2290  ;;  %v2316_v62 = vsel %vm68_vm0, %v3747_v56, 0.0 }
 0xede   :  { %3754 = vpow2.f32 %v2310_v57  ;;  %v2299_v63 = vsub.f32 %v2265_v29, %v2291_v61  ;;  %2317 = vadd.xlane.f32.xlu0 %v2316_v62 }
 0xedf   :  { %v2312_v0 = vmul.f32 1.442695, %v2298_v60 }
 0xee0   :  { %v3749_v1 = vpop.eup %3748  ;;  %v2314_v2 = vmul.f32 1.442695, %v2299_v63 }
 0xee1   :  { %3756 = vpow2.f32 %v2312_v0  ;;  %v2325_v3 = vsel %vm68_vm0, %v3749_v1, 0.0 }
 0xee2   :  { %3758 = vpow2.f32 %v2314_v2  ;;  %2326 = vadd.xlane.f32.xlu1 %v2325_v3 }
 0xee4   :  { %v3751_v4 = vpop.eup %3750 }
 0xee5   :  { %v2322_v5 = vsel %vm68_vm0, %v3751_v4, 0.0  ;;  %v3753_v6 = vpop.eup %3752 }
 0xee6   :  { %2323 = vadd.xlane.f32.xlu0 %v2322_v5  ;;  %v2328_v11 = vsel %vm68_vm0, %v3753_v6, 0.0 }
 0xee8   :  { %v3755_v7 = vpop.eup %3754 }
 0xee9   :  { %v2331_v10 = vsel %vm68_vm0, %v3755_v7, 0.0 }
 0xeea   :  { %2332 = vadd.xlane.f32.xlu1 %v2331_v10  ;;  %2329 = vadd.xlane.f32.xlu0 %v2328_v11 }
 0xeeb   :  { %v3757_v12 = vpop.eup %3756 }
 0xeec   :  { %v3759_v13 = vpop.eup %3758  ;;  %v2334_v14 = vsel %vm68_vm0, %v3757_v12, 0.0 }
 0xeed   :  { %v2337_v16 = vsel %vm68_vm0, %v3759_v13, 0.0 }
 0xeee   :  { %2338 = vadd.xlane.f32.xlu1 %v2337_v16  ;;  %2335 = vadd.xlane.f32.xlu0 %v2334_v14 }
 0xf6a   :  { %v2321_v22 = vpop.xlane.xlu1 %2320 }
 0xf6b   :  { %3760 = vrcp.f32 %v2321_v22  ;;  %v2318_v23 = vpop.xlane.xlu0 %2317  ;;  %v3206_v22 = vld [vmem:[%s4380_s11 + $0x38] sm:$0xff] }
 0xf6c   :  { %3762 = vrcp.f32 %v2318_v23 }
 0xf6f   :  { %v2327_v42 = vpop.xlane.xlu1 %2326 }
 0xf70   :  { %3764 = vrcp.f32 %v2327_v42  ;;  %v3211_v42 = vld [vmem:[%s4382_s13 + $0x40] sm:$0xff] }
 0xf73   :  { %v2324_v43 = vpop.xlane.xlu0 %2323 }
 0xf74   :  { %3766 = vrcp.f32 %v2324_v43  ;;  %v3212_v43 = vld [vmem:[%s4382_s13 + $0x48] sm:$0xff] }
 0xf75   :  { %v3761_v24 = vpop.eup %3760 }
 0xf76   :  { %v3763_v25 = vpop.eup %3762  ;;  %v2343_v26 = vmul.f32 %v3761_v24, %v3745_v55  ;;  %v3664_v55 = vpack.c.bf16 %v3196_v54, %v3195_v31  ;;  %v3213_v24 = vld [vmem:[%s4382_s13 + $0x50] sm:$0xff] }
 0xf77   :  { %v2341_v27 = vmul.f32 %v3763_v25, %v3747_v56  ;;  %v2333_v28 = vpop.xlane.xlu1 %2332  ;;  %v2330_v29 = vpop.xlane.xlu0 %2329  ;;  %v3676_v25 = vpack.c.bf16 %v3212_v43, %v3211_v42 }
 0xf78   :  { %3768 = vrcp.f32 %v2333_v28  ;;  %v3215_v28 = vld [vmem:[%s4382_s13 + $0x60] sm:$0xff] }
 0xf79   :  { %3770 = vrcp.f32 %v2330_v29  ;;  %v3645_v30 = vpack.c.bf16 %v2343_v26, %v2341_v27  ;;  %v3214_v26 = vld [vmem:[%s4382_s13 + $0x58] sm:$0xff]  ;;  %v3216_v29 = vld [vmem:[%s4382_s13 + $0x68] sm:$0xff] }
 0xf7a   :  { %v3765_v34 = vpop.eup %3764  ;;  %v3680_v27 = vpack.c.bf16 %v3214_v26, %v3213_v24 }
 0xf7b   :  { %v2339_v32 = vpop.xlane.xlu1 %2338  ;;  %3647 = vmatpush3.bf16.xpose.msk.msra.mxu1 %vm4055_vm5, %v3645_v30  ;;  %v2336_v33 = vpop.xlane.xlu0 %2335  ;;  %v2347_v36 = vmul.f32 %v3765_v34, %v3749_v1  ;;  %v3684_v30 = vpack.c.bf16 %v3216_v29, %v3215_v28 }
 0xf7c   :  { %3772 = vrcp.f32 %v2339_v32  ;;  %3652 = vmatprep.subr.bf16.mxu1 %v3808_v15 }
 0xf7d   :  { %3774 = vrcp.f32 %v2336_v33 }
 0xf7e   :  { %v3767_v35 = vpop.eup %3766 }
 0xf7f   :  { %v2345_v37 = vmul.f32 %v3767_v35, %v3751_v4 }
 0xf81   :  { %v3649_v38 = vpack.c.bf16 %v2347_v36, %v2345_v37 }
 0xf82   :  { %v3769_v39 = vpop.eup %3768  ;;  %3516 = vmatmul.mubr.msk.f32.vlgmr.msra.gmra.mrb[28].mxu1 %vm68_vm0, %v1797_v19  ;;  %v3204_v19 = vld [vmem:[%s4380_s11 + $0x28] sm:$0xff] }
 0xf83   :  { %v3771_v40 = vpop.eup %3770  ;;  %v2351_v46 = vmul.f32 %v3769_v39, %v3755_v7  ;;  %3651 = vmatpush3.bf16.xpose.msk.msra.mxu0 %vm4055_vm5, %v3649_v38  ;;  %3529 = vmatprep.mubr.msk.f32.mxu1 %vm3809_vm4, %v3810_v18  ;;  %v3201_v39 = vld [vmem:[%s4378_s9 + $0x1] ss:$0 sm:$0xff] }
 0xf84   :  { %v2349_v8 = vmul.f32 %v3771_v40, %v3753_v6  ;;  %3656 = vmatprep.subr.bf16.mxu0 %v3808_v15  ;;  %v3193_v15 = vld [vmem:[%s4377_s8 + $0x20] sm:$0xff] }
 0xf85   :  { %v3660_v52 = vpack.c.bf16 %v3194_v51, %v3193_v15  ;;  %v3218_v15 = vld [vmem:[%s4382_s13 + $0x78] sm:$0xff] }
 0xf86   :  { %v3773_v47 = vpop.eup %3772  ;;  %v3653_v48 = vpack.c.bf16 %v2351_v46, %v2349_v8  ;;  %v3202_v46 = vld [vmem:[%s4379_s10 + $0x1] ss:$0 sm:$0xff] }
 0xf87   :  { %v3775_v49 = vpop.eup %3774  ;;  %v2355_v9 = vmul.f32 %v3773_v47, %v3759_v13 }
 0xf88   :  { %v2353_v44 = vmul.f32 %v3775_v49, %v3757_v12  ;;  %3655 = vmatpush3.bf16.xpose.msk.msra.mxu1 %vm4055_vm5, %v3653_v48 }
 0xf89   :  { %3661 = vmatprep.subr.bf16.mxu1 %v3660_v52 }
 0xf8a   :  { %3523 = vmatmul.mubr.msk.f32.vlgmr.msra.gmra.mrb[28].mxu0 %vm68_vm0, %v3487_v17  ;;  %v3657_v50 = vpack.c.bf16 %v2355_v9, %v2353_v44 }
 0xf8b   :  { %3536 = vmatprep.mubr.msk.f32.mxu0 %vm3809_vm4, %v3810_v18 }
 0xf8c   :  { %3659 = vmatpush3.bf16.xpose.msk.msra.mxu0 %vm4055_vm5, %v3657_v50  ;;  %v3217_v50 = vld [vmem:[%s4382_s13 + $0x70] sm:$0xff] }
 0xf8d   :  { %v3688_v51 = vpack.c.bf16 %v3218_v15, %v3217_v50 }
 0xf8f   :  { %3530 = vmatmul.mubr.msk.f32.vlgmr.msra.gmra.mrb[30].mxu1 %vm68_vm0, %v1807_v21  ;;  %v3205_v21 = vld [vmem:[%s4380_s11 + $0x30] sm:$0xff] }
 0xf90   :  { %3663 = vmatpush3.bf16.msra.mxu1 %v3660_v52  ;;  %v3672_v23 = vpack.c.bf16 %v3206_v22, %v3205_v21  ;;  %v3208_v52 = vld [vmem:[%s4381_s12 + $0x1] ss:$0 sm:$0xff] }
 0xf91   :  { %3665 = vmatprep.subr.bf16.mxu1 %v3664_v55  ;;  %v3225_v21 = vld [vmem:[%s4384_s15 + $0x1] ss:$0 sm:$0xff] }
 0xf93   :  { %3537 = vmatmul.mubr.msk.f32.vlgmr.msra.gmra.mrb[30].mxu0 %vm68_vm0, %v3490_v20 }
 0xf94   :  { %3667 = vmatpush3.bf16.msra.mxu1 %v3664_v55 }
 0xf95   :  { %3677 = vmatprep.subr.bf16.mxu1 %v3676_v25 }
0x1055   :  { %v2431_v53 = vpop.f32.mrb[28].mxu1 }
0x1056   :  { %2672 = vxpose.xlu0.b32.start [1/4] (short) (narrow) %v2431_v53, 16  ;;  %v3517_v18 = vpop.f32.mrb[29].mxu1 }
0x105d   :  { %v2510_v56 = vpop.f32.mrb[28].mxu0 }
0x105e   :  { %2673 = vxpose.xlu0.b32.cont [2/4] (short) (narrow) %v2510_v56, 16  ;;  %v3524_v57 = vpop.f32.mrb[29].mxu0 }
0x105f   :  { %v3220_v57 = vld [vmem:[%s4383_s14 + $0x1] ss:$0 sm:$0xff] }
0x1062   :  { %v2589_v58 = vpop.f32.mrb[30].mxu1 }
0x1063   :  { %2674 = vxpose.xlu0.b32.cont [3/4] (short) (narrow) %v2589_v58, 16  ;;  %v3531_v59 = vpop.f32.mrb[31].mxu1 }
0x1066   :  { %v2668_v60 = vpop.f32.mrb[30].mxu0 }
0x1067   :  { %2675 = vxpose.xlu0.b32.end [4/4] (short) (narrow) %v2668_v60, 16  ;;  %v3538_v61 = vpop.f32.mrb[31].mxu0 }
0x10db   :  { %v2688_v62 = vpop.trf.xlu0 }
0x10dc   :  { %3547 = vmatprep.mubr.msk.f32.mxu1 %vm156_vm1, %v2688_v62 }
0x10df   :  { %v2689_v63 = vpop.trf.xlu0 }
0x10e0   :  { %3548 = vmatmul.mubr.msk.f32.vlgmr.msra.gmra.mrb[32].mxu1 %vm156_vm1, %v2689_v63 }
0x10e1   :  { %3679 = vmatpush3.bf16.msra.mxu1 %v3676_v25 }
0x10e2   :  { %3681 = vmatprep.subr.bf16.mxu1 %v3680_v27 }
0x10e5   :  { %3683 = vmatpush3.bf16.msra.mxu1 %v3680_v27 }
0x10e6   :  { %3685 = vmatprep.subr.bf16.mxu1 %v3684_v30 }
0x10e9   :  { %3687 = vmatpush3.bf16.msra.mxu1 %v3684_v30 }
0x10ea   :  { %3689 = vmatprep.subr.bf16.mxu1 %v3688_v51 }
0x10ed   :  { %3691 = vmatpush3.bf16.msra.mxu1 %v3688_v51 }
0x11b3   :  { %v3549_v0 = vpop.f32.mrb[32].mxu1 }
0x11b4   :  { %v2781_v1 = vpop.f32.mrb[33].mxu1  ;;  %v2787_v3 = vadd.f32 %v3549_v0, %v4165_v45  ;;  %v3203_v45 = vld [vmem:[%s4380_s11 + $0x20] sm:$0xff] }
0x11b5   :  { %v2782_v2 = vadd.f32 %v2781_v1, %v4163_v41  ;;  %v3668_v20 = vpack.c.bf16 %v3204_v19, %v3203_v45 }
0x11b6   :  { %v2797_v5 = vsel %vm156_vm1, %v2787_v3, 0.0 }
0x11b7   :  { %v2794_v4 = vsel %vm156_vm1, %v2782_v2, 0.0  ;;  %3669 = vmatprep.subr.bf16.mxu0 %v3668_v20 }
0x11b8   :  { %2795 = vadd.xlane.f32.xlu1 %v2794_v4  ;;  %3671 = vmatpush3.bf16.msra.mxu0 %v3668_v20 }
0x11b9   :  { %3673 = vmatprep.subr.bf16.mxu0 %v3672_v23 }
0x11bc   :  { %2798 = vadd.xlane.f32.xlu1 %v2797_v5  ;;  %3675 = vmatpush3.bf16.msra.mxu0 %v3672_v23  ;;  %v3226_v23 = vld [vmem:[%s4385_s16 + $0x1] ss:$0 sm:$0xff] }
0x1245   :  { %v2796_v6 = vpop.xlane.xlu1 %2795 }
0x1246   :  { %v2800_v7 = vmul.f32 0.03125, %v2796_v6 }
0x1248   :  { %v2802_v10 = vsub.f32 %v2782_v2, %v2800_v7 }
0x1249   :  { %v2799_v11 = vpop.xlane.xlu1 %2798 }
0x124a   :  { %v2801_v12 = vmul.f32 0.03125, %v2799_v11  ;;  %v2804_v13 = vmul.f32 %v2802_v10, %v2802_v10 }
0x124c   :  { %v2803_v14 = vsub.f32 %v2787_v3, %v2801_v12  ;;  %v2806_v16 = vsel %vm156_vm1, %v2804_v13, 0.0 }
0x124d   :  { %2807 = vadd.xlane.f32.xlu1 %v2806_v16 }
0x124e   :  { %v2805_v17 = vmul.f32 %v2803_v14, %v2803_v14 }
0x1250   :  { %v2809_v41 = vsel %vm156_vm1, %v2805_v17, 0.0 }
0x1251   :  { %2810 = vadd.xlane.f32.xlu1 %v2809_v41 }
0x12da   :  { %v2808_v32 = vpop.xlane.xlu1 %2807 }
0x12db   :  { %v2812_v33 = vmul.f32 0.03125, %v2808_v32 }
0x12dd   :  { %v2814_v34 = vadd.f32 1e-06, %v2812_v33 }
0x12de   :  { %v2811_v35 = vpop.xlane.xlu1 %2810 }
0x12df   :  { %3776 = vrsqrt.f32 %v2814_v34  ;;  %v2813_v36 = vmul.f32 0.03125, %v2811_v35 }
0x12e1   :  { %v2815_v37 = vadd.f32 1e-06, %v2813_v36 }
0x12e3   :  { %3778 = vrsqrt.f32 %v2815_v37 }
0x12e9   :  { %v3777_v38 = vpop.eup %3776 }
0x12ea   :  { %v2818_v40 = vmul.f32 %v3777_v38, %v2802_v10 }
0x12ec   :  { %v2826_v8 = vmul.f32 %v3201_v39, %v2818_v40 }
0x12ed   :  { %v3779_v47 = vpop.eup %3778 }
0x12ee   :  { %v2819_v48 = vmul.f32 %v3779_v47, %v2803_v14  ;;  %v2834_v49 = vadd.f32 %v3202_v46, %v2826_v8 }
0x12f0   :  { %v2827_v9 = vmul.f32 %v3201_v39, %v2819_v48  ;;  %3558 = vmatprep.mubr.msk.f32.mxu0 %vm156_vm1, %v2834_v49 }
0x12f2   :  { %v2835_v44 = vadd.f32 %v3202_v46, %v2827_v9 }
0x12f4   :  { %3559 = vmatmul.mubr.msk.f32.vlgmr.msra.gmra.mrb[32].mxu0 %vm156_vm1, %v2835_v44 }
0x13c7   :  { %v3560_v53 = vpop.f32.mrb[32].mxu0 }
0x13c8   :  { %v2927_v18 = vadd.f32 %v3560_v53, %v3208_v52  ;;  %v2921_v31 = vpop.f32.mrb[33].mxu0 }
0x13c9   :  { %v2922_v54 = vadd.f32 %v3208_v52, %v2921_v31 }
0x13ca   :  { %v2931_v56 = vmax.f32 %v2927_v18, 0.0 }
0x13cb   :  { %v2930_v55 = vmax.f32 %v2922_v54, 0.0 }
0x13cd   :  { %3577 = vmatprep.mubr.msk.f32.mxu1 %vm1508_vm6, %v2930_v55 }
0x13ce   :  { %3578 = vmatmul.mubr.msk.f32.vlgmr.msra.gmra.mrb[34].mxu1 %vm1508_vm6, %v2931_v56 }
0x14a1   :  { %v3579_v58 = vpop.f32.mrb[34].mxu1 }
0x14a2   :  { %v3021_v59 = vpop.f32.mrb[35].mxu1  ;;  %v3027_v60 = vadd.f32 %v3579_v58, %v3220_v57 }
0x14a3   :  { %v3022_v61 = vadd.f32 %v3220_v57, %v3021_v59 }
0x14a4   :  { %v3031_v0 = vadd.f32 %v3027_v60, %v2835_v44 }
0x14a5   :  { %v3030_v62 = vadd.f32 %v3022_v61, %v2834_v49 }
0x14a6   :  { %v3039_v1 = vsel %vm156_vm1, %v3031_v0, 0.0 }
0x14a7   :  { %v3036_v63 = vsel %vm156_vm1, %v3030_v62, 0.0 }
0x14a8   :  { %3037 = vadd.xlane.f32.xlu1 %v3036_v63 }
0x14ac   :  { %3040 = vadd.xlane.f32.xlu1 %v3039_v1 }
0x1535   :  { %v3038_v2 = vpop.xlane.xlu1 %3037 }
0x1536   :  { %v3042_v3 = vmul.f32 0.03125, %v3038_v2 }
0x1538   :  { %v3044_v4 = vsub.f32 %v3030_v62, %v3042_v3 }
0x1539   :  { %v3041_v5 = vpop.xlane.xlu1 %3040 }
0x153a   :  { %v3043_v6 = vmul.f32 0.03125, %v3041_v5  ;;  %v3046_v7 = vmul.f32 %v3044_v4, %v3044_v4 }
0x153c   :  { %v3045_v10 = vsub.f32 %v3031_v0, %v3043_v6  ;;  %v3048_v11 = vsel %vm156_vm1, %v3046_v7, 0.0 }
0x153d   :  { %3049 = vadd.xlane.f32.xlu1 %v3048_v11 }
0x153e   :  { %v3047_v12 = vmul.f32 %v3045_v10, %v3045_v10 }
0x1540   :  { %v3051_v13 = vsel %vm156_vm1, %v3047_v12, 0.0 }
0x1541   :  { %3052 = vadd.xlane.f32.xlu1 %v3051_v13 }
0x15ca   :  { %v3050_v14 = vpop.xlane.xlu1 %3049 }
0x15cb   :  { %v3054_v16 = vmul.f32 0.03125, %v3050_v14 }
0x15cd   :  { %v3056_v17 = vadd.f32 1e-06, %v3054_v16 }
0x15ce   :  { %v3053_v41 = vpop.xlane.xlu1 %3052 }
0x15cf   :  { %3780 = vrsqrt.f32 %v3056_v17  ;;  %v3055_v45 = vmul.f32 0.03125, %v3053_v41 }
0x15d1   :  { %v3057_v19 = vadd.f32 1e-06, %v3055_v45 }
0x15d3   :  { %3782 = vrsqrt.f32 %v3057_v19 }
0x15d9   :  { %v3781_v20 = vpop.eup %3780 }
0x15da   :  { %v3060_v22 = vmul.f32 %v3781_v20, %v3044_v4 }
0x15dc   :  { %v3068_v42 = vmul.f32 %v3225_v21, %v3060_v22 }
0x15dd   :  { %v3783_v43 = vpop.eup %3782 }
0x15de   :  { %v3061_v24 = vmul.f32 %v3783_v43, %v3045_v10  ;;  %v3076_v25 = vadd.f32 %v3226_v23, %v3068_v42 }
0x15e0   :  { %v3069_v26 = vmul.f32 %v3225_v21, %v3061_v24  ;;  %3078 = vst.msk [vmem:[#allocation2] sm:$0xff] %vm156_vm1, %v3076_v25 }
0x15e2   :  { %v3077_v27 = vadd.f32 %v3226_v23, %v3069_v26 }
0x15e4   :  { %3079 = vst.msk [vmem:[#allocation2 + $0x8] sm:$0xff] %vm156_vm1, %v3077_v27 }
0x15e5   :  { %3795 = shalt.err (!%p3792_p4)
}
0x15e6   :  { %s3796_s22 = scalar_lea.hbm %s4386_s17, 256 }
0x15e7   :  { %p3797_p5 = scmp.ne.s32.totalorder %s4386_s17, %s3796_s22  ;;  %p3800_p6 = scmp.lt.u32.totalorder %s3796_s22, %s4386_s17 }
0x15e9   :  { %p3802_p7 = pnand %p3800_p6, %p3797_p5 }
0x15eb   :  { %3805 = shalt.err (!%p3802_p7)
}
0x15ec   :  { %s3812_s11 = smov 128   ;;  %s3813_s25 = smov 8  }
0x15ed   :  { %3091 = dma.vmem_to_hbm [thread:$0]  %s3086_s20, 256, %s4386_s17, [#allocation3], %s3812_s11, %s3812_s11, %s3813_s25  }
0x15ee   :  { %3806 = dma.done.wait [#allocation3], 256  }
0x15ef   :  { %3807 = vsyncadd [#allocation3], 4294967040 }
0x15f0   :  { %3095 = vsyncpa [#allocation3], 1 }

</bundles_post_ra>
